<compile_context>
chip_gen: v7x
topology: tpu7x:2x2x1
jax: 0.10.0
libtpu: 0.0.40
codegen_flags: <defaults>
</compile_context>

<pallas_src>
import jax
import jax.numpy as jnp
from jax import lax
from jax.experimental import pallas as pl
from jax.experimental.pallas import tpu as pltpu

LN_EPS = 1e-5
_CDT = jnp.bfloat16  # dtype fed to the MXU


def _layernorm(x, w, b):
    mu = jnp.mean(x, axis=-1, keepdims=True)
    var = jnp.mean((x - mu) ** 2, axis=-1, keepdims=True)
    return (x - mu) * lax.rsqrt(var + LN_EPS) * w + b


def _gelu_tanh(x):
    # tanh-form GELU: one EUP tanh + a short polynomial (vs ~12 VALU-op erf poly).
    c = 0.7978845608028654  # sqrt(2/pi)
    return 0.5 * x * (1.0 + jnp.tanh(c * (x + 0.044715 * x * x * x)))


def _make_qkv_kernel(num_heads, head_dim):
    C = num_heads * head_dim

    def kernel(x_ref, ln1w_ref, ln1b_ref, qkvw_ref, qkvb_ref,
               q_ref, k_ref, v_ref):
        xn = _layernorm(x_ref[0], ln1w_ref[...], ln1b_ref[...])          # (tn, C) f32
        qkv = jnp.dot(xn.astype(_CDT), qkvw_ref[...],
                      preferred_element_type=jnp.float32) + qkvb_ref[...]
        qkv = qkv.astype(_CDT)                                            # (tn, 3C)
        # Split into head-major outputs once, here in the producer (3*N*C total),
        # so the consumer never pays per-head column relayouts on (N, hd) K/V.
        for h in range(num_heads):                                        # static unroll
            lo = h * head_dim
            hi = lo + head_dim
            q_ref[0, h] = qkv[:, lo:hi]
            k_ref[0, h] = qkv[:, C + lo:C + hi]
            v_ref[0, h] = qkv[:, 2 * C + lo:2 * C + hi]

    return kernel


def _make_attn_mlp_kernel(num_heads, head_dim):
    C = num_heads * head_dim

    def kernel(q_ref, k_ref, v_ref, x_ref,
               projw_ref, projb_ref, g1_ref,
               ln2w_ref, ln2b_ref, fc1w_ref, fc1b_ref,
               fc2w_ref, fc2b_ref, g2_ref,
               o_ref, attn_s):
        # ---- attention: per-head softmax(QK^T)V, head outputs -> (tn, C) scratch ----
        for h in range(num_heads):                                        # static unroll
            lo = h * head_dim
            q = q_ref[0, h]                                               # (tn, hd) bf16 view
            k = k_ref[0, h]                                               # (N, hd)  bf16 view
            v = v_ref[0, h]                                               # (N, hd)  bf16 view
            s = lax.dot_general(q, k, (((1,), (1,)), ((), ())),
                                preferred_element_type=jnp.float32)       # (tn, N)
            s = s - jnp.max(s, axis=-1, keepdims=True)
            e = jnp.exp(s)
            p = e * pl.reciprocal(jnp.sum(e, axis=-1, keepdims=True), approx=True)
            ho = jnp.dot(p.astype(_CDT), v,
                         preferred_element_type=jnp.float32)              # (tn, hd)
            attn_s[:, lo:lo + head_dim] = ho.astype(_CDT)

        # ONE full-depth-C projection matmul (instead of per-head K=64 accumulation).
        attn_out = jnp.dot(attn_s[...], projw_ref[...],
                           preferred_element_type=jnp.float32) + projb_ref[...]
        x1 = x_ref[0] + g1_ref[...] * attn_out                            # (tn, C) f32

        # ---- MLP ----
        xn2 = _layernorm(x1, ln2w_ref[...], ln2b_ref[...])
        h1 = jnp.dot(xn2.astype(_CDT), fc1w_ref[...],
                     preferred_element_type=jnp.float32) + fc1b_ref[...]
        h1 = _gelu_tanh(h1)
        mlp = jnp.dot(h1.astype(_CDT), fc2w_ref[...],
                      preferred_element_type=jnp.float32) + fc2b_ref[...]
        o_ref[0] = (x1 + g2_ref[...] * mlp).astype(o_ref.dtype)

    return kernel


def _vmem_capacity_bytes():
    try:
        return int(pltpu.get_tpu_info().vmem_capacity_bytes)
    except Exception:
        return 64 << 20  # conservative per-TensorCore default (v7x)


def _vmem_limit(need, cap):
    return int(min(max(need * 1.5, 32 << 20), int(0.85 * cap)))


def _pick_token_tile(N, need_fn, budget):
    cands = [c for c in (512, 256, 128, 64, 32, 16, 8) if N >= c and N % c == 0]
    for c in cands:
        if need_fn(c) <= budget:
            return c
    if cands:
        return cands[-1]
    # TODO(synk): pad N (or go flash-style) when N has no multiple-of-8 divisor.
    return N


def block_forward(x, params, num_heads):
    """Pallas forward. `params` uses PyTorch weight conventions (out, in)."""
    B, N, C = x.shape
    head_dim = C // num_heads
    hidden = params["fc1_weight"].shape[0]
    scale = head_dim ** (-0.5)

    # Fold the softmax scale into the Q rows of the QKV weight / bias.
    qkv_w = params["qkv_weight"].at[:C].multiply(scale)                  # (3C, C)
    qkv_b = jnp.concatenate([params["q_bias"] * scale,
                             jnp.zeros_like(params["v_bias"]),
                             params["v_bias"]])[None, :]

    # Big matrices transposed to (in, out) and cast bf16; vectors stay f32 (1, d).
    qkv_args = [params["ln1_weight"][None, :], params["ln1_bias"][None, :],
                qkv_w.T.astype(_CDT), qkv_b]
    attn_args = [params["proj_weight"].T.astype(_CDT), params["proj_bias"][None, :],
                 params["gamma_1"][None, :],
                 params["ln2_weight"][None, :], params["ln2_bias"][None, :],
                 params["fc1_weight"].T.astype(_CDT), params["fc1_bias"][None, :],
                 params["fc2_weight"].T.astype(_CDT), params["fc2_bias"][None, :],
                 params["gamma_2"][None, :]]

    cap = _vmem_capacity_bytes()
    budget = int(0.85 * cap)
    xbytes = x.dtype.itemsize
    # Sub-128 last dims occupy a full 128-lane tile in VMEM -> account the padding.
    hd_pad = head_dim if head_dim % 128 == 0 else ((head_dim // 128) + 1) * 128

    def run(single_buffer):
        sb = single_buffer and hasattr(pl, "Buffered")
        wmult = 1 if sb else 2
        wb_qkv = wmult * sum(int(a.size) * a.dtype.itemsize for a in qkv_args)
        wb_attn = wmult * sum(int(a.size) * a.dtype.itemsize for a in attn_args)

        def need_attn(tn):
            kv = 2 * 2 * num_heads * N * hd_pad * 2        # K + V blocks, double buffered
            qb = 2 * num_heads * tn * hd_pad * 2           # Q block
            io = 2 * tn * C * 4 + 2 * tn * C * xbytes      # x block + out block
            scr = tn * C * 2                               # attention scratch (bf16)
            tmp = 3 * tn * N * 4 + 3 * tn * hidden * 4 + 8 * tn * C * 4
            return kv + qb + io + scr + tmp + wb_attn

        def need_qkv(tn):
            io = 2 * tn * C * 4 + 3 * 2 * num_heads * tn * hd_pad * 2
            tmp = 4 * tn * 3 * C * 4 + 2 * tn * C * 4
            return io + tmp + wb_qkv

        tn = _pick_token_tile(N, need_attn, budget)
        T = N // tn

        def const_spec(shape):
            nd = len(shape)
            imap = lambda *_, nd=nd: (0,) * nd
            if sb:
                # Constant index_map -> weights need no double buffer.
                return pl.BlockSpec(shape, imap, pipeline_mode=pl.Buffered(1))
            return pl.BlockSpec(shape, imap)

        # ---- kernel 1: LN1 + QKV projection, head-major bf16 outputs ----
        qkv_call = pl.pallas_call(
            _make_qkv_kernel(num_heads, head_dim),
            out_shape=tuple(jax.ShapeDtypeStruct((B, num_heads, N, head_dim), _CDT)
                            for _ in range(3)),
            grid_spec=pltpu.PrefetchScalarGridSpec(
                num_scalar_prefetch=0,
                grid=(B, T),
                in_specs=[pl.BlockSpec((1, tn, C), lambda b, t: (b, t, 0))]
                         + [const_spec(a.shape) for a in qkv_args],
                out_specs=[pl.BlockSpec((1, num_heads, tn, head_dim),
                                        lambda b, t: (b, 0, t, 0))
                           for _ in range(3)],
            ),
            compiler_params=pltpu.CompilerParams(
                dimension_semantics=("parallel", "parallel"),
                vmem_limit_bytes=_vmem_limit(need_qkv(tn), cap)),
        )
        q_hbm, k_hbm, v_hbm = qkv_call(x, *qkv_args)

        # ---- kernel 2: per-head attention + full-C projection + MLP ----
        attn_call = pl.pallas_call(
            _make_attn_mlp_kernel(num_heads, head_dim),
            out_shape=jax.ShapeDtypeStruct((B, N, C), x.dtype),
            grid_spec=pltpu.PrefetchScalarGridSpec(
                num_scalar_prefetch=0,
                grid=(B, T),
                in_specs=[
                    pl.BlockSpec((1, num_heads, tn, head_dim), lambda b, t: (b, 0, t, 0)),
                    pl.BlockSpec((1, num_heads, N, head_dim), lambda b, t: (b, 0, 0, 0)),
                    pl.BlockSpec((1, num_heads, N, head_dim), lambda b, t: (b, 0, 0, 0)),
                    pl.BlockSpec((1, tn, C), lambda b, t: (b, t, 0)),
                ] + [const_spec(a.shape) for a in attn_args],
                out_specs=pl.BlockSpec((1, tn, C), lambda b, t: (b, t, 0)),
                scratch_shapes=[pltpu.VMEM((tn, C), _CDT)],
            ),
            compiler_params=pltpu.CompilerParams(
                dimension_semantics=("parallel", "parallel"),
                vmem_limit_bytes=_vmem_limit(need_attn(tn), cap)),
        )
        return attn_call(q_hbm, k_hbm, v_hbm, x, *attn_args)

    if not hasattr(pl, "Buffered"):
        return run(False)
    try:
        return run(True)
    except Exception as e:
        # Narrow fallback: only retry when the failure is about buffering /
        # pipeline_mode (e.g. Buffered(1) rejected); otherwise surface the error.
        msg = str(e).lower()
        if "buffer" in msg or "pipeline" in msg:
            return run(False)
        raise


# ---------------- pure-JAX reference (mirrors the PyTorch forward) ----------------
def block_reference(x, p, num_heads):
    B, N, C = x.shape
    hd = C // num_heads
    scale = hd ** (-0.5)

    def ln(y, w, b):
        mu = y.mean(-1, keepdims=True)
        var = ((y - mu) ** 2).mean(-1, keepdims=True)
        return (y - mu) / jnp.sqrt(var + LN_EPS) * w + b

    xn = ln(x, p["ln1_weight"], p["ln1_bias"])
    qkv_bias = jnp.concatenate([p["q_bias"], jnp.zeros_like(p["v_bias"]), p["v_bias"]])
    qkv = xn @ p["qkv_weight"].T + qkv_bias
    qkv = qkv.reshape(B, N, 3, num_heads, hd).transpose(2, 0, 3, 1, 4)
    q, k, v = qkv[0] * scale, qkv[1], qkv[2]
    attn = q @ jnp.swapaxes(k, -2, -1)
    attn = jax.nn.softmax(attn, axis=-1)
    out = jnp.swapaxes(attn @ v, 1, 2).reshape(B, N, -1)
    out = out @ p["proj_weight"].T + p["proj_bias"]
    x = x + p["gamma_1"] * out

    xn2 = ln(x, p["ln2_weight"], p["ln2_bias"])
    h = xn2 @ p["fc1_weight"].T + p["fc1_bias"]
    h = 0.5 * h * (1.0 + jax.scipy.special.erf(h / jnp.sqrt(2.0)))  # exact GELU
    out2 = h @ p["fc2_weight"].T + p["fc2_bias"]
    x = x + p["gamma_2"] * out2
    return x


def init_params(key, dim, num_heads, mlp_ratio=4.0, init_values=0.1):
    hidden = int(dim * mlp_ratio)
    ks = jax.random.split(key, 8)
    n = lambda k, s, sc=0.02: sc * jax.random.normal(k, s, jnp.float32)
    return {
        "ln1_weight": jnp.ones((dim,), jnp.float32),
        "ln1_bias": jnp.zeros((dim,), jnp.float32),
        "qkv_weight": n(ks[0], (3 * dim, dim)),
        "q_bias": n(ks[1], (dim,), 0.01),
        "v_bias": n(ks[2], (dim,), 0.01),
        "proj_weight": n(ks[3], (dim, dim)),
        "proj_bias": n(ks[4], (dim,), 0.01),
        "gamma_1": init_values * jnp.ones((dim,), jnp.float32),
        "ln2_weight": jnp.ones((dim,), jnp.float32),
        "ln2_bias": jnp.zeros((dim,), jnp.float32),
        "fc1_weight": n(ks[5], (hidden, dim)),
        "fc1_bias": n(ks[6], (hidden,), 0.01),
        "fc2_weight": n(ks[7], (dim, hidden)),
        "fc2_bias": jnp.zeros((dim,), jnp.float32),
        "gamma_2": init_values * jnp.ones((dim,), jnp.float32),
    }


if __name__ == "__main__":
    # C multiple of 128 / N multiple of the (8,128) tile so the test exercises
    # the lane-dense production layout.
    B, N, C = 2, 256, 128
    num_heads = 2
    key = jax.random.PRNGKey(0)
    kx, kp = jax.random.split(key)
    x = jax.random.normal(kx, (B, N, C), jnp.float32)
    params = init_params(kp, C, num_heads)

    out = jax.block_until_ready(block_forward(x, params, num_heads))
    ref = block_reference(x, params, num_heads)

    assert out.shape == (B, N, C)
    max_err = jnp.max(jnp.abs(out - ref))
    # bf16 MXU operands (f32 accumulation) + approx reciprocal + tanh GELU
    # -> loosened tolerance vs pure f32 exact-erf reference.
    assert jnp.allclose(out, ref, atol=1e-2, rtol=1e-2), f"max abs err = {max_err}"
    print("KERNEL_OK")
</pallas_src>

<mosaic_0001>
module attributes {stable_mosaic.version = 11 : i64} {
  func.func @kernel(%arg0: i32, %arg1: i32, %arg2: memref<1x256x128xf32, #tpu.memory_space<vmem>>, %arg3: memref<1x128xf32, #tpu.memory_space<vmem>>, %arg4: memref<1x128xf32, #tpu.memory_space<vmem>>, %arg5: memref<128x384xbf16, #tpu.memory_space<vmem>>, %arg6: memref<1x384xf32, #tpu.memory_space<vmem>>, %arg7: memref<1x2x256x64xbf16, #tpu.memory_space<vmem>>, %arg8: memref<1x2x256x64xbf16, #tpu.memory_space<vmem>>, %arg9: memref<1x2x256x64xbf16, #tpu.memory_space<vmem>>) attributes {dimension_semantics = [#tpu.dimension_semantics<parallel>, #tpu.dimension_semantics<parallel>], iteration_bounds = array<i64: 2, 1>, scalar_prefetch = 0 : i64, scratch_operands = 0 : i64, tpu.core_type = #tpu.core_type<tc>, window_params = [{transform_indices = @transform_0, window_bounds = array<i64: 1, 256, 128>}, {pipeline_mode = #tpu.pipeline_mode<synchronous>, transform_indices = @transform_1, window_bounds = array<i64: 1, 128>}, {pipeline_mode = #tpu.pipeline_mode<synchronous>, transform_indices = @transform_2, window_bounds = array<i64: 1, 128>}, {pipeline_mode = #tpu.pipeline_mode<synchronous>, transform_indices = @transform_3, window_bounds = array<i64: 128, 384>}, {pipeline_mode = #tpu.pipeline_mode<synchronous>, transform_indices = @transform_4, window_bounds = array<i64: 1, 384>}, {transform_indices = @transform_5, window_bounds = array<i64: 1, 2, 256, 64>}, {transform_indices = @transform_6, window_bounds = array<i64: 1, 2, 256, 64>}, {transform_indices = @transform_7, window_bounds = array<i64: 1, 2, 256, 64>}]} {
    %c0 = arith.constant 0 : index
    %c0_0 = arith.constant 0 : index
    %c0_1 = arith.constant 0 : index
    %0 = vector.load %arg2[%c0, %c0_0, %c0_1] : memref<1x256x128xf32, #tpu.memory_space<vmem>>, vector<1x256x128xf32>
    %1 = vector.shape_cast %0 : vector<1x256x128xf32> to vector<256x128xf32>
    %c0_2 = arith.constant 0 : index
    %c0_3 = arith.constant 0 : index
    %2 = vector.load %arg3[%c0_2, %c0_3] : memref<1x128xf32, #tpu.memory_space<vmem>>, vector<1x128xf32>
    %c0_4 = arith.constant 0 : index
    %c0_5 = arith.constant 0 : index
    %3 = vector.load %arg4[%c0_4, %c0_5] : memref<1x128xf32, #tpu.memory_space<vmem>>, vector<1x128xf32>
    %cst = arith.constant dense<0.000000e+00> : vector<256xf32>
    %4 = vector.multi_reduction <add>, %1, %cst [1] : vector<256x128xf32> to vector<256xf32>
    %5 = vector.shape_cast %4 : vector<256xf32> to vector<256x1xf32>
    %cst_6 = arith.constant 1.280000e+02 : f32
    %6 = vector.broadcast %cst_6 : f32 to vector<256x1xf32>
    %7 = arith.divf %5, %6 : vector<256x1xf32>
    %8 = vector.broadcast %7 : vector<256x1xf32> to vector<256x128xf32>
    %9 = arith.subf %1, %8 : vector<256x128xf32>
    %10 = arith.mulf %9, %9 : vector<256x128xf32>
    %cst_7 = arith.constant dense<0.000000e+00> : vector<256xf32>
    %11 = vector.multi_reduction <add>, %10, %cst_7 [1] : vector<256x128xf32> to vector<256xf32>
    %12 = vector.shape_cast %11 : vector<256xf32> to vector<256x1xf32>
    %cst_8 = arith.constant 1.280000e+02 : f32
    %13 = vector.broadcast %cst_8 : f32 to vector<256x1xf32>
    %14 = arith.divf %12, %13 : vector<256x1xf32>
    %15 = vector.broadcast %7 : vector<256x1xf32> to vector<256x128xf32>
    %16 = arith.subf %1, %15 : vector<256x128xf32>
    %cst_9 = arith.constant 9.99999974E-6 : f32
    %17 = vector.broadcast %cst_9 : f32 to vector<256x1xf32>
    %18 = arith.addf %14, %17 : vector<256x1xf32>
    %19 = math.rsqrt %18 : vector<256x1xf32>
    %20 = vector.broadcast %19 : vector<256x1xf32> to vector<256x128xf32>
    %21 = arith.mulf %16, %20 : vector<256x128xf32>
    %22 = vector.broadcast %2 : vector<1x128xf32> to vector<256x128xf32>
    %23 = arith.mulf %21, %22 : vector<256x128xf32>
    %24 = vector.broadcast %3 : vector<1x128xf32> to vector<256x128xf32>
    %25 = arith.addf %23, %24 : vector<256x128xf32>
    %26 = arith.truncf %25 : vector<256x128xf32> to vector<256x128xbf16>
    %c0_10 = arith.constant 0 : index
    %c0_11 = arith.constant 0 : index
    %27 = vector.load %arg5[%c0_10, %c0_11] : memref<128x384xbf16, #tpu.memory_space<vmem>>, vector<128x384xbf16>
    %cst_12 = arith.constant dense<0.000000e+00> : vector<256x384xf32>
    %28 = tpu.matmul %26, %27, %cst_12 {dimension_numbers = #tpu.dot_dimension_numbers<[1], [0], [0], [1], [0, 0, 1, 1], [], []>} : vector<256x128xbf16>, vector<128x384xbf16>, vector<256x384xf32> -> vector<256x384xf32>
    %c0_13 = arith.constant 0 : index
    %c0_14 = arith.constant 0 : index
    %29 = vector.load %arg6[%c0_13, %c0_14] : memref<1x384xf32, #tpu.memory_space<vmem>>, vector<1x384xf32>
    %30 = vector.broadcast %29 : vector<1x384xf32> to vector<256x384xf32>
    %31 = arith.addf %28, %30 : vector<256x384xf32>
    %32 = arith.truncf %31 : vector<256x384xf32> to vector<256x384xbf16>
    %33 = vector.extract_strided_slice %32 {offsets = [0, 0], sizes = [256, 64], strides = [1, 1]} : vector<256x384xbf16> to vector<256x64xbf16>
    %c0_15 = arith.constant 0 : index
    %c0_16 = arith.constant 0 : index
    %c0_17 = arith.constant 0 : index
    %c0_18 = arith.constant 0 : index
    %34 = vector.load %arg7[%c0_15, %c0_16, %c0_17, %c0_18] : memref<1x2x256x64xbf16, #tpu.memory_space<vmem>>, vector<1x1x256x64xbf16>
    %35 = vector.shape_cast %34 : vector<1x1x256x64xbf16> to vector<256x64xbf16>
    %36 = vector.shape_cast %33 : vector<256x64xbf16> to vector<1x1x256x64xbf16>
    tpu.vector_store %arg7[%c0_15, %c0_16, %c0_17, %c0_18], %36 {strides = array<i32>} : memref<1x2x256x64xbf16, #tpu.memory_space<vmem>>, vector<1x1x256x64xbf16>,
    %37 = vector.extract_strided_slice %32 {offsets = [0, 128], sizes = [256, 64], strides = [1, 1]} : vector<256x384xbf16> to vector<256x64xbf16>
    %c0_19 = arith.constant 0 : index
    %c0_20 = arith.constant 0 : index
    %c0_21 = arith.constant 0 : index
    %c0_22 = arith.constant 0 : index
    %38 = vector.load %arg8[%c0_19, %c0_20, %c0_21, %c0_22] : memref<1x2x256x64xbf16, #tpu.memory_space<vmem>>, vector<1x1x256x64xbf16>
    %39 = vector.shape_cast %38 : vector<1x1x256x64xbf16> to vector<256x64xbf16>
    %40 = vector.shape_cast %37 : vector<256x64xbf16> to vector<1x1x256x64xbf16>
    tpu.vector_store %arg8[%c0_19, %c0_20, %c0_21, %c0_22], %40 {strides = array<i32>} : memref<1x2x256x64xbf16, #tpu.memory_space<vmem>>, vector<1x1x256x64xbf16>,
    %41 = vector.extract_strided_slice %32 {offsets = [0, 256], sizes = [256, 64], strides = [1, 1]} : vector<256x384xbf16> to vector<256x64xbf16>
    %c0_23 = arith.constant 0 : index
    %c0_24 = arith.constant 0 : index
    %c0_25 = arith.constant 0 : index
    %c0_26 = arith.constant 0 : index
    %42 = vector.load %arg9[%c0_23, %c0_24, %c0_25, %c0_26] : memref<1x2x256x64xbf16, #tpu.memory_space<vmem>>, vector<1x1x256x64xbf16>
    %43 = vector.shape_cast %42 : vector<1x1x256x64xbf16> to vector<256x64xbf16>
    %44 = vector.shape_cast %41 : vector<256x64xbf16> to vector<1x1x256x64xbf16>
    tpu.vector_store %arg9[%c0_23, %c0_24, %c0_25, %c0_26], %44 {strides = array<i32>} : memref<1x2x256x64xbf16, #tpu.memory_space<vmem>>, vector<1x1x256x64xbf16>,
    %45 = vector.extract_strided_slice %32 {offsets = [0, 64], sizes = [256, 64], strides = [1, 1]} : vector<256x384xbf16> to vector<256x64xbf16>
    %c0_27 = arith.constant 0 : index
    %c1 = arith.constant 1 : index
    %c0_28 = arith.constant 0 : index
    %c0_29 = arith.constant 0 : index
    %46 = vector.load %arg7[%c0_27, %c1, %c0_28, %c0_29] : memref<1x2x256x64xbf16, #tpu.memory_space<vmem>>, vector<1x1x256x64xbf16>
    %47 = vector.shape_cast %46 : vector<1x1x256x64xbf16> to vector<256x64xbf16>
    %48 = vector.shape_cast %45 : vector<256x64xbf16> to vector<1x1x256x64xbf16>
    tpu.vector_store %arg7[%c0_27, %c1, %c0_28, %c0_29], %48 {strides = array<i32>} : memref<1x2x256x64xbf16, #tpu.memory_space<vmem>>, vector<1x1x256x64xbf16>,
    %49 = vector.extract_strided_slice %32 {offsets = [0, 192], sizes = [256, 64], strides = [1, 1]} : vector<256x384xbf16> to vector<256x64xbf16>
    %c0_30 = arith.constant 0 : index
    %c1_31 = arith.constant 1 : index
    %c0_32 = arith.constant 0 : index
    %c0_33 = arith.constant 0 : index
    %50 = vector.load %arg8[%c0_30, %c1_31, %c0_32, %c0_33] : memref<1x2x256x64xbf16, #tpu.memory_space<vmem>>, vector<1x1x256x64xbf16>
    %51 = vector.shape_cast %50 : vector<1x1x256x64xbf16> to vector<256x64xbf16>
    %52 = vector.shape_cast %49 : vector<256x64xbf16> to vector<1x1x256x64xbf16>
    tpu.vector_store %arg8[%c0_30, %c1_31, %c0_32, %c0_33], %52 {strides = array<i32>} : memref<1x2x256x64xbf16, #tpu.memory_space<vmem>>, vector<1x1x256x64xbf16>,
    %53 = vector.extract_strided_slice %32 {offsets = [0, 320], sizes = [256, 64], strides = [1, 1]} : vector<256x384xbf16> to vector<256x64xbf16>
    %c0_34 = arith.constant 0 : index
    %c1_35 = arith.constant 1 : index
    %c0_36 = arith.constant 0 : index
    %c0_37 = arith.constant 0 : index
    %54 = vector.load %arg9[%c0_34, %c1_35, %c0_36, %c0_37] : memref<1x2x256x64xbf16, #tpu.memory_space<vmem>>, vector<1x1x256x64xbf16>
    %55 = vector.shape_cast %54 : vector<1x1x256x64xbf16> to vector<256x64xbf16>
    %56 = vector.shape_cast %53 : vector<256x64xbf16> to vector<1x1x256x64xbf16>
    tpu.vector_store %arg9[%c0_34, %c1_35, %c0_36, %c0_37], %56 {strides = array<i32>} : memref<1x2x256x64xbf16, #tpu.memory_space<vmem>>, vector<1x1x256x64xbf16>,
    return
  }
  func.func @transform_0(%arg0: i32, %arg1: i32) -> (i32, i32, i32) {
    %c0_i32 = arith.constant 0 : i32
    %c0_i32_0 = arith.constant 0 : i32
    return %arg0, %arg1, %c0_i32 : i32, i32, i32
  }
  func.func @transform_1(%arg0: i32, %arg1: i32) -> (i32, i32) {
    %c0_i32 = arith.constant 0 : i32
    %c0_i32_0 = arith.constant 0 : i32
    %c0_i32_1 = arith.constant 0 : i32
    return %c0_i32, %c0_i32_0 : i32, i32
  }
  func.func @transform_2(%arg0: i32, %arg1: i32) -> (i32, i32) {
    %c0_i32 = arith.constant 0 : i32
    %c0_i32_0 = arith.constant 0 : i32
    %c0_i32_1 = arith.constant 0 : i32
    return %c0_i32, %c0_i32_0 : i32, i32
  }
  func.func @transform_3(%arg0: i32, %arg1: i32) -> (i32, i32) {
    %c0_i32 = arith.constant 0 : i32
    %c0_i32_0 = arith.constant 0 : i32
    %c0_i32_1 = arith.constant 0 : i32
    return %c0_i32, %c0_i32_0 : i32, i32
  }
  func.func @transform_4(%arg0: i32, %arg1: i32) -> (i32, i32) {
    %c0_i32 = arith.constant 0 : i32
    %c0_i32_0 = arith.constant 0 : i32
    %c0_i32_1 = arith.constant 0 : i32
    return %c0_i32, %c0_i32_0 : i32, i32
  }
  func.func @transform_5(%arg0: i32, %arg1: i32) -> (i32, i32, i32, i32) {
    %c0_i32 = arith.constant 0 : i32
    %c0_i32_0 = arith.constant 0 : i32
    %c0_i32_1 = arith.constant 0 : i32
    return %arg0, %c0_i32, %arg1, %c0_i32_0 : i32, i32, i32, i32
  }
  func.func @transform_6(%arg0: i32, %arg1: i32) -> (i32, i32, i32, i32) {
    %c0_i32 = arith.constant 0 : i32
    %c0_i32_0 = arith.constant 0 : i32
    %c0_i32_1 = arith.constant 0 : i32
    return %arg0, %c0_i32, %arg1, %c0_i32_0 : i32, i32, i32, i32
  }
  func.func @transform_7(%arg0: i32, %arg1: i32) -> (i32, i32, i32, i32) {
    %c0_i32 = arith.constant 0 : i32
    %c0_i32_0 = arith.constant 0 : i32
    %c0_i32_1 = arith.constant 0 : i32
    return %arg0, %c0_i32, %arg1, %c0_i32_0 : i32, i32, i32, i32
  }
}

</mosaic_0001>

<bundles_post_ra>
// kernel: tpu_custom_call.1
= control target key start
LH: loop header
LB: loop body
LE: loop exit
PB: predicated region body
PF: predicated region fallthrough
CT: control target
= control target key end

     0   :  { %13 = vsyncpa [#allocation3], 0  ;;  %s4782_s0 = inlined_call_operand.hbm [shape: f32[2,256,128], index: 0, kind: input, shape index: {}]   ;;  %s4783_s1 = inlined_call_operand.vmem [shape: f32[1,128], index: 1, kind: input, shape index: {}]   ;;  %s4784_s2 = inlined_call_operand.vmem [shape: f32[1,128], index: 2, kind: input, shape index: {}]   ;;  %s4785_s3 = inlined_call_operand.hbm [shape: bf16[128,384], index: 3, kind: input, shape index: {}]   ;;  %s4786_s4 = inlined_call_operand.vmem [shape: f32[1,384], index: 4, kind: input, shape index: {}]   ;;  %s4787_s5 = inlined_call_operand.vmem [shape: bf16[2,2,256,64], index: 5, kind: output, shape index: {0}]   ;;  %s4788_s6 = inlined_call_operand.vmem [shape: bf16[2,2,256,64], index: 6, kind: output, shape index: {1}]   ;;  %s4789_s7 = inlined_call_operand.vmem [shape: bf16[2,2,256,64], index: 7, kind: output, shape index: {2}]  }
   0x1   :  { %15 = vsyncpa [#allocation3 + $0x1], 0 }
   0x2   :  { %16 = vsyncpa [#allocation5], 0  ;;  %s3228_s24 = smov 0   ;;  %s3230_s25 = smov 0  }
   0x3   :  { %s3232_s26 = smov 0   ;;  %s3234_s27 = smov 0  }
   0x4   :  { %s3236_s28 = smov 0   ;;  %s3238_s29 = smov 0  }
   0x5 LB: > { %s2473_s30 = sadd.s32 4294967295, %s3178_s29   ;;  %p56_p0 = scmp.ne.s32.totalorder %s3162_s25, %s3158_s24  ;;  %s3178_s29 = sphi %s3238_s29, %s22_s29   ;;  %s3174_s28 = sphi %s3236_s28, %s4806_s28   ;;  %s3170_s27 = sphi %s3234_s27, %s4805_s27   ;;  %s3166_s26 = sphi %s3232_s26, %s4804_s26   ;;  %s3162_s25 = sphi %s3230_s25, %s4803_s25   ;;  %s3158_s24 = sphi %s3228_s24, %s4802_s24  }
   0x6   : > { %p3258_p1 = scmp.eq.s32.totalorder %s2473_s30, 0  ;;  %p2475_p2 = scmp.ge.s32.totalorder %s3178_s29, 1 }
   0x7   : > { %p235_p3 = scmp.lt.s32.totalorder %s3178_s29, 3  ;;  %s3180_s11 = smov [#allocation4]  }
   0x8   : > { %s4794_s8 = scalar_select %p3258_p1, 1, 0 }
   0x9   : > { %p3266_p4 = por %p3258_p1, %p56_p0  ;;  %p3270_p5 = pnand %p2475_p2, %p235_p3 }
   0xa   : > { %s253_s12 = sshll.u32 %s3180_s11, 4  ;;  %s34_s14 = sadd.s32 1, %s3174_s28  ;;  %s254_s12 = int_to_ptr.vmem [resolvable:$true] %s253_s12 }
   0xb   : > { %s4795_s9 = scalar_select %p3266_p4, 1, 0 }
   0xc   : > { %s4796_s10 = scalar_select %p3270_p5, 1, 0 }
   0xd   : > { %p2904_p6 = pneg %p3270_p5  ;;  %s3066_s17 = scalar_lea.hbm %s4785_s3, 3072 }
   0xe   : > { %p3067_p8 = scmp.ne.s32.totalorder %s4785_s3, %s3066_s17  ;;  %p3073_p12 = scmp.lt.u32.totalorder %s3066_s17, %s4785_s3 }
   0xf   : > { %p3278_p7 = pnand %p2904_p6, %p3258_p1 }
  0x11   : > { %p3068_p9 = pneg %p3278_p7 }
  0x13   : > { %p3069_p10 = pnand %p3068_p9, %p3067_p8 }
  0x15   : > { %p3070_p11 = pneg %p3069_p10 }
  0x17   : > { %p3075_p13 = pnand %p3073_p12, %p3070_p11 }
  0x19   : > { %3078 = shalt.err (!%p3075_p13)
}
  0x1a   : > { %s3079_s22 = scalar_lea.vmem %s254_s12, 3072  ;;  %p3087_p6 = scmp.lt.s32.totalorder %s254_s12, %s254_s12 }
  0x1b   : > { %p3080_p0 = scmp.ne.s32.totalorder %s254_s12, %s3079_s22  ;;  %p3088_p1 = scmp.lt.s32.totalorder %s3079_s22, %s3079_s22 }
  0x1d   : > { %p3082_p2 = pnand %p3080_p0, %p3068_p9  ;;  %p3089_p4 = por %p3088_p1, %p3087_p6 }
  0x1f   : > { %p3083_p3 = pneg %p3082_p2 }
  0x21   : > { %p3090_p5 = pnand %p3089_p4, %p3083_p3 }
  0x23   : > { %3093 = shalt.err (!%p3090_p5)
}
  0x24   : > { %s3181_s23 = smov 192   ;;  %s3182_s24 = smov 12  }
  0x25   : > { %2907 = dma.hbm_to_vmem [thread:$0]  (!%p3278_p7), %s4785_s3, 3072, %s254_s12, [#allocation5], %s3181_s23, %s3181_s23, %s3182_s24  }
  0x26   : > { %p36_p1 = scmp.ge.s32.totalorder %s34_s14, 2  ;;  %s43_s15 = sadd.s32 1, %s3166_s26 }
  0x27   : > { %p50_p4 = scmp.ne.s32.totalorder %s3166_s26, %s3162_s25  ;;  %p51_p5 = scmp.eq.s32.totalorder %s3178_s29, 0 }
  0x28   : > { %s4808_s14 = smov (%p36_p1, %s34_s14), 0  ;;  %p2913_p9 = scmp.lt.s32.totalorder %s3178_s29, 2 }
  0x29   : > { %p52_p8 = por %p51_p5, %p50_p4  ;;  %s38_s16 = ssub.s32 %s3174_s28, %s4808_s14 }
  0x2a   : > { %s270_s17 = sand.u32 1, %s3166_s26   ;;  %p41_p10 = scmp.eq.s32.totalorder %s38_s16, 0 }
  0x2b   : > { %s2478_s18 = sshll.u32 %s270_s17, 8  ;;  %s2710_s19 = sshll.u32 %s3174_s28, 12 }
  0x2c   : > { %s3311_s20 = scalar_select %p41_p10, %s3166_s26, %s43_s15  }
  0x2d   : > { %s3316_s12 = scalar_lea.hbm %s4782_s0, %s2710_s19  ;;  %s274_s22 = scalar_lea.vmem [#allocation2], %s2478_s18 }
  0x2e   : > { %s283_s23 = sshll.u32 %s274_s22, 4  ;;  %p3318_p7 = pnand %p2913_p9, %p52_p8  ;;  %s3322_s23 = int_to_ptr.vmem [resolvable:$true] %s283_s23 }
  0x2f   : > { %s3324_s30 = scalar_lea.sflag [#allocation3], %s270_s17  ;;  %s3094_s11 = scalar_lea.hbm %s3316_s12, 4096 }
  0x30   : > { %p3095_p11 = scmp.ne.s32.totalorder %s3316_s12, %s3094_s11  ;;  %p3096_p12 = pneg %p3318_p7 }
  0x31   : > { %s3099_s18 = scalar_lea.hbm %s4782_s0, 8192  ;;  %p3100_p2 = scmp.lt.u32.totalorder %s3316_s12, %s4782_s0 }
  0x32   : > { %p3097_p13 = pnand %p3096_p12, %p3095_p11  ;;  %p3101_p3 = scmp.lt.u32.totalorder %s3099_s18, %s3094_s11 }
  0x33   : > { %p3103_p1 = scmp.lt.u32.totalorder %s3094_s11, %s3316_s12 }
  0x34   : > { %p3098_p0 = pneg %p3097_p13  ;;  %p3102_p6 = por %p3101_p3, %p3100_p2 }
  0x36   : > { %p3104_p4 = por %p3103_p1, %p3102_p6 }
  0x38   : > { %p3105_p5 = pnand %p3104_p4, %p3098_p0 }
  0x3a   : > { %3108 = shalt.err (!%p3105_p5)
}
  0x3b   : > { %s3109_s17 = scalar_lea.vmem %s3322_s23, 4096  ;;  %s3183_s21 = smov [#allocation2]  }
  0x3c   : > { %p3110_p8 = scmp.ne.s32.totalorder %s3322_s23, %s3109_s17  ;;  %s3114_s22 = sshll.u32 %s3183_s21, 4  ;;  %s3115_s22 = int_to_ptr.vmem [resolvable:$false] %s3114_s22 }
  0x3d   : > { %s3116_s15 = scalar_lea.vmem %s3115_s22, 8192  ;;  %p3117_p11 = scmp.lt.s32.totalorder %s3322_s23, %s3115_s22 }
  0x3e   : > { %p3112_p9 = pnand %p3110_p8, %p3096_p12  ;;  %p3118_p13 = scmp.lt.s32.totalorder %s3116_s15, %s3109_s17 }
  0x40   : > { %p3113_p10 = pneg %p3112_p9  ;;  %p3119_p2 = por %p3118_p13, %p3117_p11 }
  0x42   : > { %p3120_p3 = pnand %p3119_p2, %p3113_p10 }
  0x44   : > { %3123 = shalt.err (!%p3120_p3)
}
  0x45   : > { %s3184_s11 = smov 128   ;;  %s3185_s16 = smov 8  }
  0x46   : > { %2911 = dma.hbm_to_vmem [thread:$0]  (!%p3318_p7), %s3316_s12, 4096, %s3322_s23, %s3324_s30, %s3184_s11, %s3184_s11, %s3185_s16  }
  0x47   : > { %p4799_p12 = scmp.ne.s32.totalorder %s4796_s10, 0 }
  0x48   : > { %s297_s18 = sand.u32 (!%p4799_p12), 1, %s3162_s25   ;;  %p4800_p0 = scmp.ne.s32.totalorder (!%p4799_p12), %s4795_s9, 0 }
  0x49   : > { %295 = sbr.rel (%p4799_p12) target bundleno = 928 (0x3a0), region = 40  ;;  %s2482_s19 = sshll.u32 (!%p4799_p12), %s297_s18, 8 }
  0x4a   : > { %s298_s13 = scalar_lea.sflag (!%p4799_p12), [#allocation3], %s297_s18  ;;  %s3355_s17 = scalar_lea.vmem (!%p4799_p12), [#allocation2], %s2482_s19 }
  0x50   : > { %3149 = dma.done.wait (%p4800_p0), %s298_s13, 4096  }
  0x51   : > { %3151 = vsyncadd (%p4800_p0), %s298_s13, 4294963200  ;;  %p4801_p6 = scmp.ne.s32.totalorder %s4794_s8, 0 }
  0x53   : > { %3153 = dma.done.wait (%p4801_p6), [#allocation5], 3072  }
  0x54   : > { %3155 = vsyncadd (%p4801_p6), [#allocation5], 4294964224  ;;  %v3366_v0 = vld [vmem:[%s3355_s17] sm:$0xff]  ;;  %v3374_v2 = vld [vmem:[%s3355_s17 + $0x8] sm:$0xff]  ;;  %p360_p7 = scmp.lt.s32.totalorder %s3170_s27, 1  ;;  %vm1560_vm0 = vcmask 519168  }
  0x55   : > { %v3369_v1 = vld [vmem:[%s3355_s17 + $0xc0] sm:$0xff]  ;;  %424 = vadd.xlane.f32.xlu0 %v3366_v0  ;;  %v3377_v3 = vld [vmem:[%s3355_s17 + $0xc8] sm:$0xff]  ;;  %v3382_v4 = vld [vmem:[%s3355_s17 + $0x10] sm:$0xff]  ;;  %s3187_s18 = smov 64  }
  0x56   : > { %472 = vadd.xlane.f32.xlu1 %v3369_v1  ;;  %v3385_v5 = vld [vmem:[%s3355_s17 + $0x18] sm:$0xff]  ;;  %v3390_v6 = vld [vmem:[%s3355_s17 + $0xd0] sm:$0xff]  ;;  %v3396_v8 = vld [vmem:[%s3355_s17 + $0x20] sm:$0xff]  ;;  %s4810_s27 = smov (!%p360_p7, %s3170_s27), 1 }
  0x57   : > { %v3393_v7 = vld [vmem:[%s3355_s17 + $0xd8] sm:$0xff]  ;;  %v3399_v9 = vld [vmem:[%s3355_s17 + $0x28] sm:$0xff]  ;;  %v3404_v10 = vld [vmem:[%s3355_s17 + $0xe0] sm:$0xff]  ;;  %s3828_s30 = sshll.u32 %s4810_s27, 8 }
  0x58   : > { %v3407_v11 = vld [vmem:[%s3355_s17 + $0xe8] sm:$0xff]  ;;  %v3414_v12 = vld [vmem:[%s3355_s17 + $0x30] sm:$0xff]  ;;  %v3417_v13 = vld [vmem:[%s3355_s17 + $0x38] sm:$0xff]  ;;  %s3835_s15 = scalar_lea.vmem %s4787_s5, %s3828_s30  ;;  %s3842_s16 = scalar_lea.vmem %s4788_s6, %s3828_s30 }
  0x59   : > { %426 = vadd.xlane.f32.xlu0 %v3374_v2  ;;  %v3422_v14 = vld [vmem:[%s3355_s17 + $0xf0] sm:$0xff]  ;;  %v3425_v15 = vld [vmem:[%s3355_s17 + $0xf8] sm:$0xff]  ;;  %v3430_v16 = vld [vmem:[%s3355_s17 + $0x40] sm:$0xff] }
  0x5a   : > { %474 = vadd.xlane.f32.xlu1 %v3377_v3  ;;  %v3433_v17 = vld [vmem:[%s3355_s17 + $0x48] sm:$0xff]  ;;  %v3438_v18 = vld [vmem:[%s3355_s17 + $0x50] sm:$0xff]  ;;  %v3441_v19 = vld [vmem:[%s3355_s17 + $0x58] sm:$0xff] }
  0x5b   : > { %v3446_v20 = vld [vmem:[%s3355_s17 + $0x60] sm:$0xff]  ;;  %v3449_v21 = vld [vmem:[%s3355_s17 + $0x68] sm:$0xff]  ;;  %v3454_v22 = vld [vmem:[%s3355_s17 + $0x70] sm:$0xff] }
  0x5c   : > { %v3457_v23 = vld [vmem:[%s3355_s17 + $0x78] sm:$0xff]  ;;  %v3462_v24 = vld [vmem:[%s3355_s17 + $0x80] sm:$0xff]  ;;  %v3465_v25 = vld [vmem:[%s3355_s17 + $0x88] sm:$0xff] }
  0x5d   : > { %428 = vadd.xlane.f32.xlu0 %v3382_v4  ;;  %v3470_v26 = vld [vmem:[%s3355_s17 + $0x90] sm:$0xff]  ;;  %v3473_v27 = vld [vmem:[%s3355_s17 + $0x98] sm:$0xff]  ;;  %v3478_v28 = vld [vmem:[%s3355_s17 + $0xa0] sm:$0xff] }
  0x5e   : > { %430 = vadd.xlane.f32.xlu1 %v3385_v5  ;;  %v3481_v29 = vld [vmem:[%s3355_s17 + $0xa8] sm:$0xff]  ;;  %v3486_v30 = vld [vmem:[%s3355_s17 + $0xb0] sm:$0xff]  ;;  %v3489_v31 = vld [vmem:[%s3355_s17 + $0xb8] sm:$0xff]  ;;  %s4047_s17 = scalar_lea.vmem %s4789_s7, %s3828_s30 }
  0x5f   : > { %v2970_v32 = vld [vmem:[#allocation4 + $0x4] ss:$12 sps:$4 sm:$0xff]   ;;  %v2972_v33 = vld [vmem:[#allocation4] ss:$12 sps:$4 sm:$0xff]   ;;  %v2973_v34 = vld [vmem:[#allocation4 + $0x1c] ss:$12 sps:$4 sm:$0xff]  }
  0x60   : > { %1046 = vmatprep.subr.bf16.mxu0 %v2970_v32  ;;  %2882 = vmatprep.subr.bf16.mxu1 %v2970_v32 }
  0x61   : > { %476 = vadd.xlane.f32.xlu0 %v3390_v6  ;;  %1047 = vmatpush1.bf16.msra.mxu0 %v2972_v33 }
  0x62   : > { %478 = vadd.xlane.f32.xlu1 %v3393_v7  ;;  %2890 = vmatpush1.bf16.msra.mxu1 %v2972_v33 }
  0x63   : > { %1048 = vmatprep.subr.bf16.mxu0 %v2973_v34  ;;  %2883 = vmatprep.subr.bf16.mxu1 %v2973_v34 }
  0x65   : > { %432 = vadd.xlane.f32.xlu0 %v3396_v8 }
  0x66   : > { %434 = vadd.xlane.f32.xlu1 %v3399_v9 }
  0x69   : > { %480 = vadd.xlane.f32.xlu0 %v3404_v10 }
  0x6a   : > { %482 = vadd.xlane.f32.xlu1 %v3407_v11 }
  0x6d   : > { %436 = vadd.xlane.f32.xlu0 %v3414_v12 }
  0x6e   : > { %438 = vadd.xlane.f32.xlu1 %v3417_v13 }
  0x71   : > { %484 = vadd.xlane.f32.xlu0 %v3422_v14 }
  0x72   : > { %486 = vadd.xlane.f32.xlu1 %v3425_v15 }
  0x75   : > { %440 = vadd.xlane.f32.xlu0 %v3430_v16 }
  0x76   : > { %442 = vadd.xlane.f32.xlu1 %v3433_v17 }
  0x79   : > { %444 = vadd.xlane.f32.xlu0 %v3438_v18 }
  0x7a   : > { %446 = vadd.xlane.f32.xlu1 %v3441_v19 }
  0x7d   : > { %448 = vadd.xlane.f32.xlu0 %v3446_v20 }
  0x7e   : > { %450 = vadd.xlane.f32.xlu1 %v3449_v21 }
  0x81   : > { %452 = vadd.xlane.f32.xlu0 %v3454_v22 }
  0x82   : > { %454 = vadd.xlane.f32.xlu1 %v3457_v23 }
  0x85   : > { %456 = vadd.xlane.f32.xlu0 %v3462_v24 }
  0x86   : > { %458 = vadd.xlane.f32.xlu1 %v3465_v25 }
  0x89   : > { %460 = vadd.xlane.f32.xlu0 %v3470_v26 }
  0x8a   : > { %462 = vadd.xlane.f32.xlu1 %v3473_v27 }
  0x8d   : > { %464 = vadd.xlane.f32.xlu0 %v3478_v28 }
  0x8e   : > { %466 = vadd.xlane.f32.xlu1 %v3481_v29 }
  0x91   : > { %468 = vadd.xlane.f32.xlu0 %v3486_v30 }
  0x92   : > { %470 = vadd.xlane.f32.xlu1 %v3489_v31 }
  0xe2   : > { %v425_v35 = vpop.xlane.xlu0 %424 }
  0xe3   : > { %v473_v36 = vpop.xlane.xlu1 %472  ;;  %v489_v37 = vmul.f32 0.0078125, %v425_v35 }
  0xe4   : > { %v513_v38 = vmul.f32 0.0078125, %v473_v36 }
  0xe5   : > { %v3494_v39 = vsub.f32 %v3366_v0, %v489_v37 }
  0xe6   : > { %v3497_v40 = vsub.f32 %v3369_v1, %v513_v38  ;;  %v427_v41 = vpop.xlane.xlu0 %426 }
  0xe7   : > { %v475_v42 = vpop.xlane.xlu1 %474  ;;  %v490_v43 = vmul.f32 0.0078125, %v427_v41  ;;  %v553_v44 = vmul.f32 %v3494_v39, %v3494_v39  ;;  %v2976_v41 = vld [vmem:[#allocation4 + $0x34] ss:$12 sps:$4 sm:$0xff]  }
  0xe8   : > { %v514_v45 = vmul.f32 0.0078125, %v475_v42  ;;  %v577_v46 = vmul.f32 %v3497_v40, %v3497_v40 }
  0xe9   : > { %585 = vadd.xlane.f32.xlu0 %v553_v44  ;;  %v3504_v47 = vsub.f32 %v3374_v2, %v490_v43 }
  0xea   : > { %v3507_v48 = vsub.f32 %v3377_v3, %v514_v45  ;;  %v429_v49 = vpop.xlane.xlu0 %428  ;;  %v2978_v45 = vld [vmem:[#allocation4 + $0x30] ss:$12 sps:$4 sm:$0xff]  }
  0xeb   : > { %v431_v50 = vpop.xlane.xlu1 %430  ;;  %v491_v51 = vmul.f32 0.0078125, %v429_v49  ;;  %v554_v52 = vmul.f32 %v3504_v47, %v3504_v47 }
  0xec   : > { %v492_v53 = vmul.f32 0.0078125, %v431_v50  ;;  %v578_v54 = vmul.f32 %v3507_v48, %v3507_v48 }
  0xed   : > { %633 = vadd.xlane.f32.xlu0 %v577_v46  ;;  %587 = vadd.xlane.f32.xlu1 %v554_v52  ;;  %v3514_v55 = vsub.f32 %v3382_v4, %v491_v51  ;;  %v2979_v52 = vld [vmem:[#allocation4 + $0x4c] ss:$12 sps:$4 sm:$0xff]  }
  0xee   : > { %v3517_v56 = vsub.f32 %v3385_v5, %v492_v53  ;;  %v477_v57 = vpop.xlane.xlu0 %476 }
  0xef   : > { %v479_v58 = vpop.xlane.xlu1 %478  ;;  %v515_v59 = vmul.f32 0.0078125, %v477_v57  ;;  %v555_v60 = vmul.f32 %v3514_v55, %v3514_v55  ;;  %v2981_v57 = vld [vmem:[#allocation4 + $0x48] ss:$12 sps:$4 sm:$0xff]  }
  0xf0   : > { %v516_v61 = vmul.f32 0.0078125, %v479_v58  ;;  %v556_v62 = vmul.f32 %v3517_v56, %v3517_v56 }
  0xf1   : > { %635 = vadd.xlane.f32.xlu1 %v578_v54  ;;  %589 = vadd.xlane.f32.xlu0 %v555_v60  ;;  %v3524_v63 = vsub.f32 %v3390_v6, %v515_v59 }
  0xf2   : > { %v3527_v0 = vsub.f32 %v3393_v7, %v516_v61  ;;  %v433_v1 = vpop.xlane.xlu0 %432  ;;  %v2975_v7 = vld [vmem:[#allocation4 + $0x18] ss:$12 sps:$4 sm:$0xff]  }
  0xf3   : > { %v435_v2 = vpop.xlane.xlu1 %434  ;;  %v493_v3 = vmul.f32 0.0078125, %v433_v1  ;;  %v579_v4 = vmul.f32 %v3524_v63, %v3524_v63  ;;  %1049 = vmatpush1.bf16.msra.mxu0 %v2975_v7  ;;  %2891 = vmatpush1.bf16.msra.mxu1 %v2975_v7 }
  0xf4   : > { %v494_v5 = vmul.f32 0.0078125, %v435_v2  ;;  %v580_v32 = vmul.f32 %v3527_v0, %v3527_v0  ;;  %1050 = vmatprep.subr.bf16.mxu0 %v2976_v41  ;;  %2884 = vmatprep.subr.bf16.mxu1 %v2976_v41 }
  0xf5   : > { %591 = vadd.xlane.f32.xlu1 %v556_v62  ;;  %637 = vadd.xlane.f32.xlu0 %v579_v4  ;;  %v3534_v33 = vsub.f32 %v3396_v8, %v493_v3  ;;  %v2982_v62 = vld [vmem:[#allocation4 + $0x64] ss:$12 sps:$4 sm:$0xff]   ;;  %v2984_v3 = vld [vmem:[#allocation4 + $0x60] ss:$12 sps:$4 sm:$0xff]  }
  0xf6   : > { %v3537_v6 = vsub.f32 %v3399_v9, %v494_v5  ;;  %v481_v34 = vpop.xlane.xlu0 %480 }
  0xf7   : > { %v483_v35 = vpop.xlane.xlu1 %482  ;;  %v517_v36 = vmul.f32 0.0078125, %v481_v34  ;;  %v557_v37 = vmul.f32 %v3534_v33, %v3534_v33  ;;  %1051 = vmatpush1.bf16.msra.mxu0 %v2978_v45  ;;  %2892 = vmatpush1.bf16.msra.mxu1 %v2978_v45  ;;  %v2985_v34 = vld [vmem:[#allocation4 + $0x7c] ss:$12 sps:$4 sm:$0xff]  }
  0xf8   : > { %v518_v38 = vmul.f32 0.0078125, %v483_v35  ;;  %v558_v8 = vmul.f32 %v3537_v6, %v3537_v6  ;;  %1052 = vmatprep.subr.bf16.mxu0 %v2979_v52  ;;  %2885 = vmatprep.subr.bf16.mxu1 %v2979_v52 }
  0xf9   : > { %639 = vadd.xlane.f32.xlu1 %v580_v32  ;;  %593 = vadd.xlane.f32.xlu0 %v557_v37  ;;  %v3544_v42 = vsub.f32 %v3404_v10, %v517_v36  ;;  %v2987_v37 = vld [vmem:[#allocation4 + $0x78] ss:$12 sps:$4 sm:$0xff]  }
  0xfa   : > { %v3547_v9 = vsub.f32 %v3407_v11, %v518_v38  ;;  %v437_v43 = vpop.xlane.xlu0 %436 }
  0xfb   : > { %v439_v44 = vpop.xlane.xlu1 %438  ;;  %v495_v46 = vmul.f32 0.0078125, %v437_v43  ;;  %v581_v49 = vmul.f32 %v3544_v42, %v3544_v42  ;;  %1053 = vmatpush1.bf16.msra.mxu0 %v2981_v57  ;;  %2893 = vmatpush1.bf16.msra.mxu1 %v2981_v57 }
  0xfc   : > { %v496_v50 = vmul.f32 0.0078125, %v439_v44  ;;  %v582_v10 = vmul.f32 %v3547_v9, %v3547_v9  ;;  %1054 = vmatprep.subr.bf16.mxu0 %v2982_v62  ;;  %2886 = vmatprep.subr.bf16.mxu1 %v2982_v62  ;;  %v2988_v44 = vld [vmem:[#allocation4 + $0x94] ss:$12 sps:$4 sm:$0xff]  }
  0xfd   : > { %595 = vadd.xlane.f32.xlu1 %v558_v8  ;;  %641 = vadd.xlane.f32.xlu0 %v581_v49  ;;  %v3554_v11 = vsub.f32 %v3414_v12, %v495_v46  ;;  %v2990_v49 = vld [vmem:[#allocation4 + $0x90] ss:$12 sps:$4 sm:$0xff]  }
  0xfe   : > { %v3557_v51 = vsub.f32 %v3417_v13, %v496_v50  ;;  %v485_v53 = vpop.xlane.xlu0 %484 }
  0xff   : > { %v487_v54 = vpop.xlane.xlu1 %486  ;;  %v519_v58 = vmul.f32 0.0078125, %v485_v53  ;;  %v559_v59 = vmul.f32 %v3554_v11, %v3554_v11  ;;  %1055 = vmatpush1.bf16.msra.mxu0 %v2984_v3  ;;  %2894 = vmatpush1.bf16.msra.mxu1 %v2984_v3 }
 0x100   : > { %v520_v60 = vmul.f32 0.0078125, %v487_v54  ;;  %v560_v12 = vmul.f32 %v3557_v51, %v3557_v51  ;;  %1056 = vmatprep.subr.bf16.mxu0 %v2985_v34  ;;  %2887 = vmatprep.subr.bf16.mxu1 %v2985_v34  ;;  %v2991_v54 = vld [vmem:[#allocation4 + $0xac] ss:$12 sps:$4 sm:$0xff]  }
 0x101   : > { %643 = vadd.xlane.f32.xlu1 %v582_v10  ;;  %597 = vadd.xlane.f32.xlu0 %v559_v59  ;;  %v3564_v13 = vsub.f32 %v3422_v14, %v519_v58  ;;  %v2993_v59 = vld [vmem:[#allocation4 + $0xa8] ss:$12 sps:$4 sm:$0xff]  }
 0x102   : > { %v3567_v61 = vsub.f32 %v3425_v15, %v520_v60  ;;  %v441_v1 = vpop.xlane.xlu0 %440 }
 0x103   : > { %v443_v2 = vpop.xlane.xlu1 %442  ;;  %v497_v4 = vmul.f32 0.0078125, %v441_v1  ;;  %v583_v5 = vmul.f32 %v3564_v13, %v3564_v13  ;;  %1057 = vmatpush1.bf16.msra.mxu0 %v2987_v37  ;;  %2895 = vmatpush1.bf16.msra.mxu1 %v2987_v37 }
 0x104   : > { %v498_v32 = vmul.f32 0.0078125, %v443_v2  ;;  %v584_v14 = vmul.f32 %v3567_v61, %v3567_v61  ;;  %1058 = vmatprep.subr.bf16.mxu0 %v2988_v44  ;;  %2888 = vmatprep.subr.bf16.mxu1 %v2988_v44 }
 0x105   : > { %599 = vadd.xlane.f32.xlu1 %v560_v12  ;;  %645 = vadd.xlane.f32.xlu0 %v583_v5  ;;  %v3574_v15 = vsub.f32 %v3430_v16, %v497_v4  ;;  %v3186_v4 = vmov 0  }
 0x106   : > { %v3577_v7 = vsub.f32 %v3433_v17, %v498_v32  ;;  %v445_v35 = vpop.xlane.xlu0 %444  ;;  %1078 = vmatprep.mubr.bf16.mxu0 %v3186_v4  ;;  %1198 = vmatprep.mubr.bf16.mxu1 %v3186_v4 }
 0x107   : > { %v447_v36 = vpop.xlane.xlu1 %446  ;;  %v499_v38 = vmul.f32 0.0078125, %v445_v35  ;;  %v561_v41 = vmul.f32 %v3574_v15, %v3574_v15  ;;  %1059 = vmatpush1.bf16.msra.mxu0 %v2990_v49  ;;  %2896 = vmatpush1.bf16.msra.mxu1 %v2990_v49  ;;  %v3621_v35 = vld [vmem:[#allocation4 + $0x8] ss:$12 sps:$4 sm:$0xff]  }
 0x108   : > { %v500_v8 = vmul.f32 0.0078125, %v447_v36  ;;  %v562_v16 = vmul.f32 %v3577_v7, %v3577_v7  ;;  %1060 = vmatprep.subr.bf16.mxu0 %v2991_v54  ;;  %2889 = vmatprep.subr.bf16.mxu1 %v2991_v54 }
 0x109   : > { %647 = vadd.xlane.f32.xlu1 %v584_v14  ;;  %601 = vadd.xlane.f32.xlu0 %v561_v41  ;;  %v3584_v17 = vsub.f32 %v3438_v18, %v499_v38 }
 0x10a   : > { %v3587_v43 = vsub.f32 %v3441_v19, %v500_v8  ;;  %v449_v45 = vpop.xlane.xlu0 %448 }
 0x10b   : > { %v451_v46 = vpop.xlane.xlu1 %450  ;;  %v501_v50 = vmul.f32 0.0078125, %v449_v45  ;;  %v563_v10 = vmul.f32 %v3584_v17, %v3584_v17  ;;  %1061 = vmatpush1.bf16.msra.mxu0 %v2993_v59  ;;  %2897 = vmatpush1.bf16.msra.mxu1 %v2993_v59 }
 0x10c   : > { %v502_v52 = vmul.f32 0.0078125, %v451_v46  ;;  %v564_v18 = vmul.f32 %v3587_v43, %v3587_v43  ;;  %2834 = vmatprep.subr.bf16.mxu1 %v3621_v35 }
 0x10d   : > { %603 = vadd.xlane.f32.xlu1 %v562_v16  ;;  %605 = vadd.xlane.f32.xlu0 %v563_v10  ;;  %v3594_v19 = vsub.f32 %v3446_v20, %v501_v50 }
 0x10e   : > { %v3597_v53 = vsub.f32 %v3449_v21, %v502_v52  ;;  %v453_v57 = vpop.xlane.xlu0 %452 }
 0x10f   : > { %v455_v58 = vpop.xlane.xlu1 %454  ;;  %v503_v60 = vmul.f32 0.0078125, %v453_v57  ;;  %v565_v12 = vmul.f32 %v3594_v19, %v3594_v19 }
 0x110   : > { %v504_v62 = vmul.f32 0.0078125, %v455_v58  ;;  %v566_v20 = vmul.f32 %v3597_v53, %v3597_v53 }
 0x111   : > { %607 = vadd.xlane.f32.xlu1 %v564_v18  ;;  %609 = vadd.xlane.f32.xlu0 %v565_v12  ;;  %v3604_v21 = vsub.f32 %v3454_v22, %v503_v60 }
 0x112   : > { %v3607_v1 = vsub.f32 %v3457_v23, %v504_v62  ;;  %v457_v2 = vpop.xlane.xlu0 %456 }
 0x113   : > { %v459_v3 = vpop.xlane.xlu1 %458  ;;  %v505_v5 = vmul.f32 0.0078125, %v457_v2  ;;  %v567_v32 = vmul.f32 %v3604_v21, %v3604_v21 }
 0x114   : > { %v506_v14 = vmul.f32 0.0078125, %v459_v3  ;;  %v568_v22 = vmul.f32 %v3607_v1, %v3607_v1 }
 0x115   : > { %611 = vadd.xlane.f32.xlu1 %v566_v20  ;;  %613 = vadd.xlane.f32.xlu0 %v567_v32  ;;  %v3616_v23 = vsub.f32 %v3462_v24, %v505_v5 }
 0x116   : > { %v3619_v34 = vsub.f32 %v3465_v25, %v506_v14  ;;  %v461_v36 = vpop.xlane.xlu0 %460 }
 0x117   : > { %v463_v37 = vpop.xlane.xlu1 %462  ;;  %v507_v38 = vmul.f32 0.0078125, %v461_v36  ;;  %v569_v41 = vmul.f32 %v3616_v23, %v3616_v23 }
 0x118   : > { %v508_v8 = vmul.f32 0.0078125, %v463_v37  ;;  %v570_v24 = vmul.f32 %v3619_v34, %v3619_v34 }
 0x119   : > { %615 = vadd.xlane.f32.xlu1 %v568_v22  ;;  %617 = vadd.xlane.f32.xlu0 %v569_v41  ;;  %v3629_v16 = vsub.f32 %v3470_v26, %v507_v38 }
 0x11a   : > { %v3632_v25 = vsub.f32 %v3473_v27, %v508_v8  ;;  %v465_v44 = vpop.xlane.xlu0 %464 }
 0x11b   : > { %v467_v45 = vpop.xlane.xlu1 %466  ;;  %v509_v46 = vmul.f32 0.0078125, %v465_v44  ;;  %v571_v49 = vmul.f32 %v3629_v16, %v3629_v16 }
 0x11c   : > { %v510_v50 = vmul.f32 0.0078125, %v467_v45  ;;  %v572_v10 = vmul.f32 %v3632_v25, %v3632_v25 }
 0x11d   : > { %619 = vadd.xlane.f32.xlu1 %v570_v24  ;;  %621 = vadd.xlane.f32.xlu0 %v571_v49  ;;  %v3639_v52 = vsub.f32 %v3478_v28, %v509_v46 }
 0x11e   : > { %v3642_v26 = vsub.f32 %v3481_v29, %v510_v50  ;;  %v469_v27 = vpop.xlane.xlu0 %468 }
 0x11f   : > { %v471_v18 = vpop.xlane.xlu1 %470  ;;  %v511_v54 = vmul.f32 0.0078125, %v469_v27  ;;  %v573_v57 = vmul.f32 %v3639_v52, %v3639_v52 }
 0x120   : > { %v512_v58 = vmul.f32 0.0078125, %v471_v18  ;;  %v574_v59 = vmul.f32 %v3642_v26, %v3642_v26 }
 0x121   : > { %623 = vadd.xlane.f32.xlu1 %v572_v10  ;;  %625 = vadd.xlane.f32.xlu0 %v573_v57  ;;  %v3649_v60 = vsub.f32 %v3486_v30, %v511_v54 }
 0x122   : > { %v3652_v28 = vsub.f32 %v3489_v31, %v512_v58 }
 0x123   : > { %v575_v29 = vmul.f32 %v3649_v60, %v3649_v60 }
 0x124   : > { %v576_v12 = vmul.f32 %v3652_v28, %v3652_v28 }
 0x125   : > { %627 = vadd.xlane.f32.xlu1 %v574_v59  ;;  %629 = vadd.xlane.f32.xlu0 %v575_v29  ;;  %v3662_v59 = vld [vmem:[%s4783_s1] ss:$0 sm:$0xff] }
 0x129   : > { %631 = vadd.xlane.f32.xlu1 %v576_v12 }
 0x176   : > { %v586_v62 = vpop.xlane.xlu0 %585 }
 0x177   : > { %v649_v20 = vmul.f32 0.0078125, %v586_v62 }
 0x179   : > { %v681_v2 = vadd.f32 1e-05, %v649_v20 }
 0x17a   : > { %v588_v3 = vpop.xlane.xlu1 %587  ;;  %v634_v5 = vpop.xlane.xlu0 %633 }
 0x17b   : > { %3002 = vrsqrt.f32 %v681_v2  ;;  %v650_v30 = vmul.f32 0.0078125, %v588_v3  ;;  %v673_v32 = vmul.f32 0.0078125, %v634_v5 }
 0x17d   : > { %v682_v14 = vadd.f32 1e-05, %v650_v30  ;;  %v705_v31 = vadd.f32 1e-05, %v673_v32 }
 0x17e   : > { %v636_v22 = vpop.xlane.xlu1 %635  ;;  %v590_v36 = vpop.xlane.xlu0 %589 }
 0x17f   : > { %3004 = vrsqrt.f32 %v682_v14  ;;  %v674_v37 = vmul.f32 0.0078125, %v636_v22  ;;  %v651_v38 = vmul.f32 0.0078125, %v590_v36  ;;  %v3669_v14 = vld [vmem:[%s4784_s2] ss:$0 sm:$0xff] }
 0x180   : > { %3006 = vrsqrt.f32 %v705_v31 }
 0x181   : > { %v706_v41 = vadd.f32 1e-05, %v674_v37  ;;  %v683_v8 = vadd.f32 1e-05, %v651_v38 }
 0x182   : > { %v592_v24 = vpop.xlane.xlu1 %591  ;;  %v638_v44 = vpop.xlane.xlu0 %637 }
 0x183   : > { %3008 = vrsqrt.f32 %v706_v41  ;;  %v652_v45 = vmul.f32 0.0078125, %v592_v24  ;;  %v675_v46 = vmul.f32 0.0078125, %v638_v44 }
 0x184   : > { %3010 = vrsqrt.f32 %v683_v8 }
 0x185   : > { %v3003_v49 = vpop.eup %3002  ;;  %v684_v50 = vadd.f32 1e-05, %v652_v45  ;;  %v707_v10 = vadd.f32 1e-05, %v675_v46 }
 0x186   : > { %v640_v27 = vpop.xlane.xlu1 %639  ;;  %v594_v18 = vpop.xlane.xlu0 %593  ;;  %v745_v54 = vmul.f32 %v3003_v49, %v3494_v39 }
 0x187   : > { %3012 = vrsqrt.f32 %v684_v50  ;;  %v676_v57 = vmul.f32 0.0078125, %v640_v27  ;;  %v653_v58 = vmul.f32 0.0078125, %v594_v18 }
 0x188   : > { %3014 = vrsqrt.f32 %v707_v10  ;;  %v783_v30 = vmul.f32 %v3662_v59, %v745_v54 }
 0x189   : > { %v3005_v29 = vpop.eup %3004  ;;  %v708_v12 = vadd.f32 1e-05, %v676_v57  ;;  %v685_v62 = vadd.f32 1e-05, %v653_v58 }
 0x18a   : > { %v3007_v20 = vpop.eup %3006  ;;  %v596_v2 = vpop.xlane.xlu1 %595  ;;  %v746_v5 = vmul.f32 %v3005_v29, %v3504_v47  ;;  %v821_v24 = vadd.f32 %v3669_v14, %v783_v30 }
 0x18b   : > { %v642_v3 = vpop.xlane.xlu0 %641  ;;  %3016 = vrsqrt.f32 %v708_v12  ;;  %v654_v39 = vmul.f32 0.0078125, %v596_v2  ;;  %v769_v31 = vmul.f32 %v3007_v20, %v3497_v40 }
 0x18c   : > { %v677_v32 = vmul.f32 0.0078125, %v642_v3  ;;  %3018 = vrsqrt.f32 %v685_v62  ;;  %v784_v22 = vmul.f32 %v3662_v59, %v746_v5 }
 0x18d   : > { %v3009_v36 = vpop.eup %3008  ;;  %v686_v37 = vadd.f32 1e-05, %v654_v39  ;;  %v807_v46 = vmul.f32 %v3662_v59, %v769_v31 }
 0x18e   : > { %v709_v38 = vadd.f32 1e-05, %v677_v32  ;;  %v3011_v41 = vpop.eup %3010  ;;  %v644_v47 = vpop.xlane.xlu1 %643  ;;  %v822_v44 = vadd.f32 %v3669_v14, %v784_v22  ;;  %v770_v45 = vmul.f32 %v3009_v36, %v3507_v48  ;;  %v2995_v32 = vld [vmem:[#allocation4 + $0x20] ss:$12 sps:$4 sm:$0xff]  }
 0x18f   : > { %v598_v8 = vpop.xlane.xlu0 %597  ;;  %3020 = vrsqrt.f32 %v686_v37  ;;  %v678_v49 = vmul.f32 0.0078125, %v644_v47  ;;  %v747_v27 = vmul.f32 %v3011_v41, %v3514_v55  ;;  %v845_v12 = vadd.f32 %v3669_v14, %v807_v46 }
 0x190   : > { %v655_v40 = vmul.f32 0.0078125, %v598_v8  ;;  %3022 = vrsqrt.f32 %v709_v38  ;;  %v3677_v50 = vpack.c.bf16 %v822_v44, %v821_v24  ;;  %v808_v10 = vmul.f32 %v3662_v59, %v770_v45 }
 0x191   : > { %v3013_v18 = vpop.eup %3012  ;;  %v710_v54 = vadd.f32 1e-05, %v678_v49  ;;  %v785_v2 = vmul.f32 %v3662_v59, %v747_v27  ;;  %v2996_v49 = vld [vmem:[#allocation4 + $0x38] ss:$12 sps:$4 sm:$0xff]  }
 0x192   : > { %v687_v57 = vadd.f32 1e-05, %v655_v40  ;;  %v3015_v58 = vpop.eup %3014  ;;  %v600_v29 = vpop.xlane.xlu1 %599  ;;  %1079 = vmatmul.mubr.bf16.vlgmr.msra.gmra.mrb[0].mxu0 %v3677_v50  ;;  %v846_v62 = vadd.f32 %v3669_v14, %v808_v10  ;;  %v748_v20 = vmul.f32 %v3013_v18, %v3517_v56 }
 0x193   : > { %v646_v48 = vpop.xlane.xlu0 %645  ;;  %3024 = vrsqrt.f32 %v710_v54  ;;  %v656_v3 = vmul.f32 0.0078125, %v600_v29  ;;  %1088 = vmatprep.mubr.bf16.mxu0 %v3186_v4  ;;  %v771_v55 = vmul.f32 %v3015_v58, %v3524_v63  ;;  %v823_v41 = vadd.f32 %v3669_v14, %v785_v2 }
 0x194   : > { %v679_v5 = vmul.f32 0.0078125, %v646_v48  ;;  %3026 = vrsqrt.f32 %v687_v57  ;;  %v3688_v30 = vpack.c.bf16 %v846_v62, %v845_v12  ;;  %v786_v39 = vmul.f32 %v3662_v59, %v748_v20 }
 0x195   : > { %v3017_v31 = vpop.eup %3016  ;;  %v688_v22 = vadd.f32 1e-05, %v656_v3  ;;  %v809_v8 = vmul.f32 %v3662_v59, %v771_v55  ;;  %v2997_v3 = vld [vmem:[#allocation4 + $0x50] ss:$12 sps:$4 sm:$0xff]  }
 0x196   : > { %v711_v36 = vadd.f32 1e-05, %v679_v5  ;;  %v3019_v37 = vpop.eup %3018  ;;  %v648_v56 = vpop.xlane.xlu1 %647  ;;  %1199 = vmatmul.mubr.bf16.vlgmr.msra.gmra.mrb[0].mxu1 %v3688_v30  ;;  %v824_v47 = vadd.f32 %v3669_v14, %v786_v39  ;;  %v772_v63 = vmul.f32 %v3017_v31, %v3527_v0 }
 0x197   : > { %v602_v38 = vpop.xlane.xlu0 %601  ;;  %3028 = vrsqrt.f32 %v688_v22  ;;  %v680_v24 = vmul.f32 0.0078125, %v648_v56  ;;  %2835 = vmatpush3.bf16.msra.mxu1 %v3621_v35  ;;  %1208 = vmatprep.mubr.bf16.mxu1 %v3186_v4  ;;  %v749_v40 = vmul.f32 %v3019_v37, %v3534_v33  ;;  %v847_v35 = vadd.f32 %v3669_v14, %v809_v8 }
 0x198   : > { %v657_v44 = vmul.f32 0.0078125, %v602_v38  ;;  %3030 = vrsqrt.f32 %v711_v36  ;;  %v3698_v45 = vpack.c.bf16 %v824_v47, %v823_v41  ;;  %2836 = vmatprep.subr.bf16.mxu1 %v2995_v32  ;;  %v810_v46 = vmul.f32 %v3662_v59, %v772_v63  ;;  %v2998_v47 = vld [vmem:[#allocation4 + $0x68] ss:$12 sps:$4 sm:$0xff]  }
 0x199   : > { %v3021_v10 = vpop.eup %3020  ;;  %v712_v0 = vadd.f32 1e-05, %v680_v24  ;;  %v787_v48 = vmul.f32 %v3662_v59, %v749_v40 }
 0x19a   : > { %v689_v27 = vadd.f32 1e-05, %v657_v44  ;;  %v3023_v18 = vpop.eup %3022  ;;  %v604_v54 = vpop.xlane.xlu1 %603  ;;  %1089 = vmatmul.mubr.bf16.gmra.mrb[4].mxu0 %v3698_v45  ;;  %v848_v58 = vadd.f32 %v3669_v14, %v810_v46  ;;  %v750_v29 = vmul.f32 %v3021_v10, %v3537_v6 }
 0x19b   : > { %v606_v57 = vpop.xlane.xlu0 %605  ;;  %3032 = vrsqrt.f32 %v712_v0  ;;  %v658_v12 = vmul.f32 0.0078125, %v604_v54  ;;  %2837 = vmatpush3.bf16.msra.mxu1 %v2995_v32  ;;  %1098 = vmatprep.mubr.bf16.mxu0 %v3186_v4  ;;  %v773_v33 = vmul.f32 %v3023_v18, %v3544_v42  ;;  %v825_v32 = vadd.f32 %v3669_v14, %v787_v48 }
 0x19c   : > { %v659_v62 = vmul.f32 0.0078125, %v606_v57  ;;  %3034 = vrsqrt.f32 %v689_v27  ;;  %v3709_v20 = vpack.c.bf16 %v848_v58, %v847_v35  ;;  %2838 = vmatprep.subr.bf16.mxu1 %v2996_v49  ;;  %v788_v2 = vmul.f32 %v3662_v59, %v750_v29  ;;  %v2999_v35 = vld [vmem:[#allocation4 + $0x80] ss:$12 sps:$4 sm:$0xff]  }
 0x19d   : > { %v3025_v5 = vpop.eup %3024  ;;  %v690_v55 = vadd.f32 1e-05, %v658_v12  ;;  %v811_v37 = vmul.f32 %v3662_v59, %v773_v33 }
 0x19e   : > { %v691_v6 = vadd.f32 1e-05, %v659_v62  ;;  %v3027_v39 = vpop.eup %3026  ;;  %v608_v31 = vpop.xlane.xlu1 %607  ;;  %1209 = vmatmul.mubr.bf16.gmra.mrb[4].mxu1 %v3709_v20  ;;  %v826_v36 = vadd.f32 %v3669_v14, %v788_v2  ;;  %v774_v42 = vmul.f32 %v3025_v5, %v3547_v9 }
 0x19f   : > { %v610_v22 = vpop.xlane.xlu0 %609  ;;  %3036 = vrsqrt.f32 %v690_v55  ;;  %v660_v56 = vmul.f32 0.0078125, %v608_v31  ;;  %2839 = vmatpush3.bf16.msra.mxu1 %v2996_v49  ;;  %1218 = vmatprep.mubr.bf16.mxu1 %v3186_v4  ;;  %v751_v63 = vmul.f32 %v3027_v39, %v3554_v11  ;;  %v849_v49 = vadd.f32 %v3669_v14, %v811_v37  ;;  %v3000_v39 = vld [vmem:[#allocation4 + $0x98] ss:$12 sps:$4 sm:$0xff]  }
 0x1a0   : > { %3038 = vrsqrt.f32 %v691_v6  ;;  %v3718_v38 = vpack.c.bf16 %v826_v36, %v825_v32  ;;  %2840 = vmatprep.subr.bf16.mxu1 %v2997_v3  ;;  %v812_v41 = vmul.f32 %v3662_v59, %v774_v42  ;;  %v661_v44 = vmul.f32 0.0078125, %v610_v22 }
 0x1a1   : > { %v3029_v8 = vpop.eup %3028  ;;  %v692_v24 = vadd.f32 1e-05, %v660_v56  ;;  %v789_v27 = vmul.f32 %v3662_v59, %v751_v63 }
 0x1a2   : > { %v3031_v9 = vpop.eup %3030  ;;  %v612_v46 = vpop.xlane.xlu1 %611  ;;  %1099 = vmatmul.mubr.bf16.gmra.mrb[8].mxu0 %v3718_v38  ;;  %v850_v10 = vadd.f32 %v3669_v14, %v812_v41  ;;  %v752_v0 = vmul.f32 %v3029_v8, %v3557_v51  ;;  %v693_v29 = vadd.f32 1e-05, %v661_v44 }
 0x1a3   : > { %v614_v40 = vpop.xlane.xlu0 %613  ;;  %3040 = vrsqrt.f32 %v692_v24  ;;  %v662_v18 = vmul.f32 0.0078125, %v612_v46  ;;  %2841 = vmatpush3.bf16.msra.mxu1 %v2997_v3  ;;  %1108 = vmatprep.mubr.bf16.mxu0 %v3186_v4  ;;  %v775_v11 = vmul.f32 %v3031_v9, %v3564_v13  ;;  %v827_v33 = vadd.f32 %v3669_v14, %v789_v27  ;;  %v3001_v9 = vld [vmem:[#allocation4 + $0xb0] ss:$12 sps:$4 sm:$0xff]  }
 0x1a4   : > { %v3729_v54 = vpack.c.bf16 %v850_v10, %v849_v49  ;;  %2842 = vmatprep.subr.bf16.mxu1 %v2998_v47  ;;  %v790_v57 = vmul.f32 %v3662_v59, %v752_v0  ;;  %v663_v32 = vmul.f32 0.0078125, %v614_v40 }
 0x1a5   : > { %v3033_v58 = vpop.eup %3032  ;;  %v694_v48 = vadd.f32 1e-05, %v662_v18  ;;  %v813_v3 = vmul.f32 %v3662_v59, %v775_v11 }
 0x1a6   : > { %v3035_v12 = vpop.eup %3034  ;;  %v616_v51 = vpop.xlane.xlu1 %615  ;;  %1219 = vmatmul.mubr.bf16.gmra.mrb[8].mxu1 %v3729_v54  ;;  %v828_v2 = vadd.f32 %v3669_v14, %v790_v57  ;;  %v776_v13 = vmul.f32 %v3033_v58, %v3567_v61  ;;  %v695_v40 = vadd.f32 1e-05, %v663_v32 }
 0x1a7   : > { %v618_v62 = vpop.xlane.xlu0 %617  ;;  %3042 = vrsqrt.f32 %v694_v48  ;;  %v664_v5 = vmul.f32 0.0078125, %v616_v51  ;;  %2843 = vmatpush3.bf16.msra.mxu1 %v2998_v47  ;;  %1228 = vmatprep.mubr.bf16.mxu1 %v3186_v4  ;;  %v753_v31 = vmul.f32 %v3035_v12, %v3574_v15  ;;  %v851_v37 = vadd.f32 %v3669_v14, %v813_v3 }
 0x1a8   : > { %v3738_v55 = vpack.c.bf16 %v828_v2, %v827_v33  ;;  %2844 = vmatprep.subr.bf16.mxu1 %v2999_v35  ;;  %v814_v6 = vmul.f32 %v3662_v59, %v776_v13  ;;  %3044 = vrsqrt.f32 %v693_v29  ;;  %v665_v49 = vmul.f32 0.0078125, %v618_v62 }
 0x1a9   : > { %v3037_v22 = vpop.eup %3036  ;;  %v791_v47 = vmul.f32 %v3662_v59, %v753_v31  ;;  %v696_v63 = vadd.f32 1e-05, %v664_v5 }
 0x1aa   : > { %v3039_v36 = vpop.eup %3038  ;;  %v620_v61 = vpop.xlane.xlu1 %619  ;;  %1109 = vmatmul.mubr.bf16.gmra.mrb[12].mxu0 %v3738_v55  ;;  %v852_v56 = vadd.f32 %v3669_v14, %v814_v6  ;;  %v754_v41 = vmul.f32 %v3037_v22, %v3577_v7  ;;  %v697_v33 = vadd.f32 1e-05, %v665_v49 }
 0x1ab   : > { %v622_v42 = vpop.xlane.xlu0 %621  ;;  %v666_v8 = vmul.f32 0.0078125, %v620_v61  ;;  %2845 = vmatpush3.bf16.msra.mxu1 %v2999_v35  ;;  %1118 = vmatprep.mubr.bf16.mxu0 %v3186_v4  ;;  %v755_v7 = vmul.f32 %v3039_v36, %v3584_v17  ;;  %v829_v11 = vadd.f32 %v3669_v14, %v791_v47  ;;  %3046 = vrsqrt.f32 %v696_v63 }
 0x1ac   : > { %v667_v24 = vmul.f32 0.0078125, %v622_v42  ;;  %v3748_v15 = vpack.c.bf16 %v852_v56, %v851_v37  ;;  %2846 = vmatprep.subr.bf16.mxu1 %v3000_v39  ;;  %v792_v44 = vmul.f32 %v3662_v59, %v754_v41 }
 0x1ad   : > { %v3041_v46 = vpop.eup %3040  ;;  %v698_v0 = vadd.f32 1e-05, %v666_v8  ;;  %v793_v13 = vmul.f32 %v3662_v59, %v755_v7 }
 0x1ae   : > { %v699_v10 = vadd.f32 1e-05, %v667_v24  ;;  %v624_v27 = vpop.xlane.xlu1 %623  ;;  %1229 = vmatmul.mubr.bf16.gmra.mrb[12].mxu1 %v3748_v15  ;;  %v830_v57 = vadd.f32 %v3669_v14, %v792_v44  ;;  %v756_v35 = vmul.f32 %v3041_v46, %v3587_v43 }
 0x1af   : > { %v626_v18 = vpop.xlane.xlu0 %625  ;;  %v668_v58 = vmul.f32 0.0078125, %v624_v27  ;;  %2847 = vmatpush3.bf16.msra.mxu1 %v3000_v39  ;;  %2850 = vmatprep.mubr.bf16.mxu1 %v3677_v50  ;;  %v831_v36 = vadd.f32 %v3669_v14, %v793_v13 }
 0x1b0   : > { %v669_v29 = vmul.f32 0.0078125, %v626_v18  ;;  %3048 = vrsqrt.f32 %v699_v10  ;;  %v857_v48 = vpack.c.bf16 %v830_v57, %v829_v11  ;;  %2848 = vmatprep.subr.bf16.mxu1 %v3001_v9  ;;  %v794_v17 = vmul.f32 %v3662_v59, %v756_v35 }
 0x1b1   : > { %v3043_v12 = vpop.eup %3042  ;;  %3050 = vrsqrt.f32 %v695_v40  ;;  %v700_v51 = vadd.f32 1e-05, %v668_v58 }
 0x1b2   : > { %v701_v62 = vadd.f32 1e-05, %v669_v29  ;;  %3052 = vrsqrt.f32 %v698_v0  ;;  %v628_v2 = vpop.xlane.xlu1 %627  ;;  %1119 = vmatmul.mubr.bf16.gmra.mrb[16].mxu0 %v857_v48  ;;  %v3045_v3 = vpop.eup %3044  ;;  %v832_v6 = vadd.f32 %v3669_v14, %v794_v17  ;;  %v758_v39 = vmul.f32 %v3043_v12, %v3597_v53 }
 0x1b3   : > { %v630_v43 = vpop.xlane.xlu0 %629  ;;  %3054 = vrsqrt.f32 %v700_v51  ;;  %v670_v5 = vmul.f32 0.0078125, %v628_v2  ;;  %2849 = vmatpush3.bf16.msra.mxu1 %v3001_v9  ;;  %1128 = vmatprep.mubr.bf16.mxu0 %v3186_v4  ;;  %v757_v61 = vmul.f32 %v3045_v3, %v3594_v19 }
 0x1b4   : > { %v671_v50 = vmul.f32 0.0078125, %v630_v43  ;;  %3056 = vrsqrt.f32 %v701_v62  ;;  %v858_v37 = vpack.c.bf16 %v832_v6, %v831_v36  ;;  %v796_v56 = vmul.f32 %v3662_v59, %v758_v39 }
 0x1b5   : > { %v702_v31 = vadd.f32 1e-05, %v670_v5  ;;  %3058 = vrsqrt.f32 %v697_v33  ;;  %v3047_v41 = vpop.eup %3046  ;;  %v795_v63 = vmul.f32 %v3662_v59, %v757_v61 }
 0x1b6   : > { %v703_v22 = vadd.f32 1e-05, %v671_v50  ;;  %v632_v32 = vpop.xlane.xlu1 %631  ;;  %2851 = vmatmul.mubr.bf16.vlgmr.msra.gmra.mrb[16].mxu1 %v3698_v45  ;;  %v834_v24 = vadd.f32 %v3669_v14, %v796_v56 }
 0x1b7   : > { %3060 = vrsqrt.f32 %v702_v31  ;;  %v672_v42 = vmul.f32 0.0078125, %v632_v32  ;;  %2854 = vmatprep.mubr.bf16.mxu1 %v3718_v38  ;;  %v760_v38 = vmul.f32 %v3047_v41, %v3607_v1  ;;  %v833_v40 = vadd.f32 %v3669_v14, %v795_v63 }
 0x1b8   : > { %3062 = vrsqrt.f32 %v703_v22 }
 0x1b9   : > { %v704_v53 = vadd.f32 1e-05, %v672_v42  ;;  %v859_v27 = vpack.c.bf16 %v834_v24, %v833_v40  ;;  %v798_v1 = vmul.f32 %v3662_v59, %v760_v38 }
 0x1ba   : > { %v3049_v47 = vpop.eup %3048  ;;  %1129 = vmatmul.mubr.bf16.gmra.mrb[20].mxu0 %v858_v37 }
 0x1bb   : > { %v3051_v8 = vpop.eup %3050  ;;  %3064 = vrsqrt.f32 %v704_v53  ;;  %1138 = vmatprep.mubr.bf16.mxu0 %v3186_v4  ;;  %v763_v19 = vmul.f32 %v3049_v47, %v3629_v16 }
 0x1bc   : > { %v3053_v45 = vpop.eup %3052  ;;  %v759_v49 = vmul.f32 %v3051_v8, %v3604_v21 }
 0x1bd   : > { %v3055_v44 = vpop.eup %3054  ;;  %v801_v9 = vmul.f32 %v3662_v59, %v763_v19 }
 0x1be   : > { %v3057_v46 = vpop.eup %3056  ;;  %2855 = vmatmul.mubr.bf16.gmra.mrb[20].mxu1 %v3738_v55  ;;  %v764_v10 = vmul.f32 %v3055_v44, %v3632_v25  ;;  %v762_v55 = vmul.f32 %v3053_v45, %v3619_v34  ;;  %v797_v21 = vmul.f32 %v3662_v59, %v759_v49  ;;  %v836_v34 = vadd.f32 %v3669_v14, %v798_v1 }
 0x1bf   : > { %2858 = vmatprep.mubr.bf16.mxu1 %v857_v48  ;;  %v839_v16 = vadd.f32 %v3669_v14, %v801_v9  ;;  %v765_v7 = vmul.f32 %v3057_v46, %v3639_v52  ;;  %v3059_v0 = vpop.eup %3058 }
 0x1c0   : > { %v802_v18 = vmul.f32 %v3662_v59, %v764_v10  ;;  %v761_v52 = vmul.f32 %v3059_v0, %v3616_v23  ;;  %v800_v62 = vmul.f32 %v3662_v59, %v762_v55 }
 0x1c1   : > { %v3061_v11 = vpop.eup %3060  ;;  %v803_v57 = vmul.f32 %v3662_v59, %v765_v7 }
 0x1c2   : > { %v3063_v35 = vpop.eup %3062  ;;  %1139 = vmatmul.mubr.bf16.gmra.mrb[24].mxu0 %v859_v27  ;;  %v840_v25 = vadd.f32 %v3669_v14, %v802_v18  ;;  %v766_v58 = vmul.f32 %v3061_v11, %v3642_v26  ;;  %v835_v26 = vadd.f32 %v3669_v14, %v797_v21  ;;  %v838_v50 = vadd.f32 %v3669_v14, %v800_v62 }
 0x1c3   : > { %1148 = vmatprep.mubr.bf16.mxu0 %v3186_v4  ;;  %v841_v29 = vadd.f32 %v3669_v14, %v803_v57  ;;  %v767_v48 = vmul.f32 %v3063_v35, %v3649_v60  ;;  %v799_v60 = vmul.f32 %v3662_v59, %v761_v52 }
 0x1c4   : > { %v862_v17 = vpack.c.bf16 %v840_v25, %v839_v16  ;;  %v804_v12 = vmul.f32 %v3662_v59, %v766_v58  ;;  %v860_v13 = vpack.c.bf16 %v836_v34, %v835_v26 }
 0x1c5   : > { %v3065_v51 = vpop.eup %3064  ;;  %v805_v33 = vmul.f32 %v3662_v59, %v767_v48  ;;  %v837_v39 = vadd.f32 %v3669_v14, %v799_v60 }
 0x1c6   : > { %2859 = vmatmul.mubr.bf16.gmra.mrb[24].mxu1 %v858_v37  ;;  %v842_v2 = vadd.f32 %v3669_v14, %v804_v12  ;;  %v768_v23 = vmul.f32 %v3065_v51, %v3652_v28 }
 0x1c7   : > { %2862 = vmatprep.mubr.bf16.mxu1 %v859_v27  ;;  %v843_v43 = vadd.f32 %v3669_v14, %v805_v33  ;;  %v861_v28 = vpack.c.bf16 %v838_v50, %v837_v39 }
 0x1c8   : > { %v863_v3 = vpack.c.bf16 %v842_v2, %v841_v29  ;;  %v806_v5 = vmul.f32 %v3662_v59, %v768_v23  ;;  %v903_v59 = vlaneseq }
 0x1ca   : > { %1149 = vmatmul.mubr.bf16.gmra.mrb[28].mxu0 %v860_v13  ;;  %v844_v6 = vadd.f32 %v3669_v14, %v806_v5  ;;  %v3811_v14 = vshrl.u32 %v903_v59, 7 }
 0x1cb   : > { %1158 = vmatprep.mubr.bf16.mxu0 %v3186_v4 }
 0x1cc   : > { %v864_v31 = vpack.c.bf16 %v844_v6, %v843_v43  ;;  %v905_v22 = vsub.s32 0, %v3811_v14 }
 0x1ce   : > { %2863 = vmatmul.mubr.bf16.gmra.mrb[28].mxu1 %v860_v13 }
 0x1cf   : > { %2866 = vmatprep.mubr.bf16.mxu1 %v861_v28 }
 0x1d2   : > { %1159 = vmatmul.mubr.bf16.gmra.mrb[32].mxu0 %v861_v28 }
 0x1d3   : > { %1168 = vmatprep.mubr.bf16.mxu0 %v3186_v4 }
 0x1d6   : > { %2867 = vmatmul.mubr.bf16.gmra.mrb[32].mxu1 %v862_v17 }
 0x1d7   : > { %2870 = vmatprep.mubr.bf16.mxu1 %v863_v3 }
 0x1da   : > { %1169 = vmatmul.mubr.bf16.gmra.mrb[36].mxu0 %v862_v17 }
 0x1db   : > { %1178 = vmatprep.mubr.bf16.mxu0 %v3186_v4 }
 0x1de   : > { %2871 = vmatmul.mubr.bf16.gmra.mrb[36].mxu1 %v864_v31 }
 0x1df   : > { %2874 = vmatprep.mubr.bf16.mxu1 %v3688_v30  ;;  %v3818_v30 = vld [vmem:[%s4786_s4] sm:$0x7] }
 0x1e2   : > { %1179 = vmatmul.mubr.bf16.gmra.mrb[40].mxu0 %v863_v3 }
 0x1e3   : > { %1188 = vmatprep.mubr.bf16.mxu0 %v3186_v4  ;;  %v909_v4 = vsub.s32 1, %v3811_v14 }
 0x1e6   : > { %2875 = vmatmul.mubr.bf16.gmra.mrb[40].mxu1 %v3709_v20  ;;  %v3823_v20 = vrot.slane %v3818_v30, %v905_v22 }
 0x1e7   : > { %2878 = vmatprep.mubr.bf16.mxu1 %v3729_v54  ;;  %v3826_v54 = vrot.slane %v3818_v30, %v909_v4 }
 0x1ea   : > { %1189 = vmatmul.mubr.bf16.gmra.mrb[44].mxu0 %v864_v31 }
 0x1ee   : > { %2879 = vmatmul.mubr.bf16.gmra.mrb[44].mxu1 %v3748_v15 }
 0x265   : > { %v1080_v15 = vpop.f32.mrb[0].mxu0 }
 0x266   : > { %v1081_v32 = vadd.f32 %v1080_v15, %v3823_v20  ;;  %v1082_v36 = vpop.f32.mrb[1].mxu0 }
 0x267   : > { %v1083_v61 = vadd.f32 %v1082_v36, %v3826_v54  ;;  %v1084_v42 = vpop.f32.mrb[2].mxu0 }
 0x268   : > { %v2714_v37 = vpack.c.bf16 %v1081_v32, %v1081_v32  ;;  %v1085_v56 = vadd.f32 %v1084_v42, %v3823_v20  ;;  %v1086_v41 = vpop.f32.mrb[3].mxu0 }
 0x269   : > { %v2746_v53 = vpack.c.bf16 %v1083_v61, %v1083_v61  ;;  %v1087_v47 = vadd.f32 %v1086_v41, %v3826_v54  ;;  %v1200_v63 = vpop.f32.mrb[0].mxu1 }
 0x26a   : > { %1561 = vst.msk [vmem:[%s3835_s15] sm:$0xf] %vm1560_vm0, %v2714_v37  ;;  %v2715_v8 = vpack.c.bf16 %v1085_v56, %v1085_v56  ;;  %v1201_v19 = vadd.f32 %v1200_v63, %v3823_v20  ;;  %1881 = vrot.lane.b32.xlu0 %v2714_v37, %s3187_s18  ;;  %v1202_v45 = vpop.f32.mrb[1].mxu1 }
 0x26b   : > { %1705 = vst.msk [vmem:[%s3842_s16] sm:$0xf] %vm1560_vm0, %v2746_v53  ;;  %v2747_v24 = vpack.c.bf16 %v1087_v47, %v1087_v47  ;;  %v1203_v38 = vadd.f32 %v1202_v45, %v3826_v54  ;;  %v1204_v44 = vpop.f32.mrb[2].mxu1 }
 0x26c   : > { %1562 = vst.msk [vmem:[%s3835_s15 + $0x4] sm:$0xf] %vm1560_vm0, %v2715_v8  ;;  %v2738_v9 = vpack.c.bf16 %v1201_v19, %v1201_v19  ;;  %v1205_v46 = vadd.f32 %v1204_v44, %v3823_v20  ;;  %1883 = vrot.lane.b32.xlu1 %v2715_v8, %s3187_s18  ;;  %v1206_v40 = vpop.f32.mrb[3].mxu1 }
 0x26d   : > { %1706 = vst.msk [vmem:[%s3842_s16 + $0x4] sm:$0xf] %vm1560_vm0, %v2747_v24  ;;  %v2770_v49 = vpack.c.bf16 %v1203_v38, %v1203_v38  ;;  %v1207_v10 = vadd.f32 %v1206_v40, %v3826_v54  ;;  %v1090_v16 = vpop.f32.mrb[4].mxu0 }
 0x26e   : > { %1585 = vst.msk [vmem:[%s3835_s15 + $0x60] sm:$0xf] %vm1560_vm0, %v2738_v9  ;;  %v2739_v7 = vpack.c.bf16 %v1205_v46, %v1205_v46  ;;  %v1091_v0 = vadd.f32 %v1090_v16, %v3823_v20  ;;  %1929 = vrot.lane.b32.xlu0 %v2738_v9, %s3187_s18  ;;  %v1092_v27 = vpop.f32.mrb[5].mxu0 }
 0x26f   : > { %1729 = vst.msk [vmem:[%s3842_s16 + $0x60] sm:$0xf] %vm1560_vm0, %v2770_v49  ;;  %v2771_v1 = vpack.c.bf16 %v1207_v10, %v1207_v10  ;;  %v1093_v18 = vadd.f32 %v1092_v27, %v3826_v54  ;;  %v1094_v11 = vpop.f32.mrb[6].mxu0 }
 0x270   : > { %1586 = vst.msk [vmem:[%s3835_s15 + $0x64] sm:$0xf] %vm1560_vm0, %v2739_v7  ;;  %v2716_v55 = vpack.c.bf16 %v1091_v0, %v1091_v0  ;;  %v1095_v57 = vadd.f32 %v1094_v11, %v3823_v20  ;;  %1931 = vrot.lane.b32.xlu1 %v2739_v7, %s3187_s18  ;;  %v1096_v35 = vpop.f32.mrb[7].mxu0 }
 0x271   : > { %1730 = vst.msk [vmem:[%s3842_s16 + $0x64] sm:$0xf] %vm1560_vm0, %v2771_v1  ;;  %v2748_v21 = vpack.c.bf16 %v1093_v18, %v1093_v18  ;;  %v1097_v25 = vadd.f32 %v1096_v35, %v3826_v54  ;;  %v1210_v58 = vpop.f32.mrb[4].mxu1 }
 0x272   : > { %1563 = vst.msk [vmem:[%s3835_s15 + $0x8] sm:$0xf] %vm1560_vm0, %v2716_v55  ;;  %v3876_v52 = vpack.c.bf16 %v1095_v57, %v1095_v57  ;;  %v1211_v29 = vadd.f32 %v1210_v58, %v3823_v20  ;;  %2010 = vrot.lane.b32.xlu0 %v2746_v53, %s3187_s18  ;;  %v1212_v48 = vpop.f32.mrb[5].mxu1 }
 0x273   : > { %1707 = vst.msk [vmem:[%s3842_s16 + $0x8] sm:$0xf] %vm1560_vm0, %v2748_v21  ;;  %v3882_v34 = vpack.c.bf16 %v1097_v25, %v1097_v25  ;;  %v1213_v17 = vadd.f32 %v1212_v48, %v3826_v54  ;;  %v1214_v12 = vpop.f32.mrb[6].mxu1 }
 0x274   : > { %1564 = vst.msk [vmem:[%s3835_s15 + $0xc] sm:$0xf] %vm1560_vm0, %v3876_v52  ;;  %v2740_v51 = vpack.c.bf16 %v1211_v29, %v1211_v29  ;;  %v1215_v62 = vadd.f32 %v1214_v12, %v3823_v20  ;;  %2012 = vrot.lane.b32.xlu1 %v2747_v24, %s3187_s18  ;;  %v1216_v33 = vpop.f32.mrb[7].mxu1 }
 0x275   : > { %1708 = vst.msk [vmem:[%s3842_s16 + $0xc] sm:$0xf] %vm1560_vm0, %v3882_v34  ;;  %v2772_v26 = vpack.c.bf16 %v1213_v17, %v1213_v17  ;;  %v1217_v2 = vadd.f32 %v1216_v33, %v3826_v54  ;;  %v1100_v23 = vpop.f32.mrb[8].mxu0 }
 0x276   : > { %1587 = vst.msk [vmem:[%s3835_s15 + $0x68] sm:$0xf] %vm1560_vm0, %v2740_v51  ;;  %v3896_v60 = vpack.c.bf16 %v1215_v62, %v1215_v62  ;;  %v1101_v43 = vadd.f32 %v1100_v23, %v3823_v20  ;;  %2058 = vrot.lane.b32.xlu0 %v2770_v49, %s3187_s18  ;;  %v1102_v13 = vpop.f32.mrb[9].mxu0 }
 0x277   : > { %1731 = vst.msk [vmem:[%s3842_s16 + $0x68] sm:$0xf] %vm1560_vm0, %v2772_v26  ;;  %v3902_v3 = vpack.c.bf16 %v1217_v2, %v1217_v2  ;;  %v1103_v5 = vadd.f32 %v1102_v13, %v3826_v54  ;;  %v1104_v50 = vpop.f32.mrb[10].mxu0 }
 0x278   : > { %1588 = vst.msk [vmem:[%s3835_s15 + $0x6c] sm:$0xf] %vm1560_vm0, %v3896_v60  ;;  %v3908_v6 = vpack.c.bf16 %v1101_v43, %v1101_v43  ;;  %v1105_v39 = vadd.f32 %v1104_v50, %v3823_v20  ;;  %2060 = vrot.lane.b32.xlu1 %v2771_v1, %s3187_s18  ;;  %v1106_v31 = vpop.f32.mrb[11].mxu0  ;;  %v913_v1 = vsub.s32 2, %v3811_v14 }
 0x279   : > { %1732 = vst.msk [vmem:[%s3842_s16 + $0x6c] sm:$0xf] %vm1560_vm0, %v3902_v3  ;;  %v3915_v28 = vpack.c.bf16 %v1103_v5, %v1103_v5  ;;  %v1107_v59 = vadd.f32 %v1106_v31, %v3826_v54  ;;  %v1220_v22 = vpop.f32.mrb[8].mxu1 }
 0x27a   : > { %1565 = vst.msk [vmem:[%s3835_s15 + $0x10] sm:$0xf] %vm1560_vm0, %v3908_v6  ;;  %v3921_v4 = vpack.c.bf16 %v1105_v39, %v1105_v39  ;;  %v1221_v15 = vadd.f32 %v1220_v22, %v3823_v20  ;;  %1933 = vrot.lane.b32.xlu0 %v2740_v51, %s3187_s18  ;;  %v1222_v32 = vpop.f32.mrb[9].mxu1  ;;  %v4008_v17 = vrot.slane %v3818_v30, %v913_v1 }
 0x27b   : > { %1709 = vst.msk [vmem:[%s3842_s16 + $0x10] sm:$0xf] %vm1560_vm0, %v3915_v28  ;;  %v3928_v36 = vpack.c.bf16 %v1107_v59, %v1107_v59  ;;  %v1223_v61 = vadd.f32 %v1222_v32, %v3826_v54  ;;  %v1224_v42 = vpop.f32.mrb[10].mxu1 }
 0x27c   : > { %1566 = vst.msk [vmem:[%s3835_s15 + $0x14] sm:$0xf] %vm1560_vm0, %v3921_v4  ;;  %v3934_v37 = vpack.c.bf16 %v1221_v15, %v1221_v15  ;;  %v1225_v56 = vadd.f32 %v1224_v42, %v3823_v20  ;;  %1885 = vrot.lane.b32.xlu1 %v2716_v55, %s3187_s18  ;;  %v1226_v41 = vpop.f32.mrb[11].mxu1 }
 0x27d   : > { %1710 = vst.msk [vmem:[%s3842_s16 + $0x14] sm:$0xf] %vm1560_vm0, %v3928_v36  ;;  %v3941_v53 = vpack.c.bf16 %v1223_v61, %v1223_v61  ;;  %v1227_v47 = vadd.f32 %v1226_v41, %v3826_v54  ;;  %v1110_v63 = vpop.f32.mrb[12].mxu0 }
 0x27e   : > { %1589 = vst.msk [vmem:[%s3835_s15 + $0x70] sm:$0xf] %vm1560_vm0, %v3934_v37  ;;  %v3947_v8 = vpack.c.bf16 %v1225_v56, %v1225_v56  ;;  %v1111_v19 = vadd.f32 %v1110_v63, %v3823_v20  ;;  %2014 = vrot.lane.b32.xlu0 %v2748_v21, %s3187_s18  ;;  %v1112_v45 = vpop.f32.mrb[13].mxu0 }
 0x27f   : > { %1733 = vst.msk [vmem:[%s3842_s16 + $0x70] sm:$0xf] %vm1560_vm0, %v3941_v53  ;;  %v3954_v24 = vpack.c.bf16 %v1227_v47, %v1227_v47  ;;  %v1113_v38 = vadd.f32 %v1112_v45, %v3826_v54  ;;  %v1114_v44 = vpop.f32.mrb[14].mxu0 }
 0x280   : > { %1590 = vst.msk [vmem:[%s3835_s15 + $0x74] sm:$0xf] %vm1560_vm0, %v3947_v8  ;;  %v3960_v9 = vpack.c.bf16 %v1111_v19, %v1111_v19  ;;  %v1115_v46 = vadd.f32 %v1114_v44, %v3823_v20  ;;  %1887 = vrot.lane.b32.xlu1 %v3876_v52, %s3187_s18  ;;  %v1116_v40 = vpop.f32.mrb[15].mxu0 }
 0x281   : > { %1734 = vst.msk [vmem:[%s3842_s16 + $0x74] sm:$0xf] %vm1560_vm0, %v3954_v24  ;;  %v3968_v49 = vpack.c.bf16 %v1113_v38, %v1113_v38  ;;  %v1117_v10 = vadd.f32 %v1116_v40, %v3826_v54  ;;  %v1230_v16 = vpop.f32.mrb[12].mxu1 }
 0x282   : > { %1567 = vst.msk [vmem:[%s3835_s15 + $0x18] sm:$0xf] %vm1560_vm0, %v3960_v9  ;;  %v3974_v7 = vpack.c.bf16 %v1115_v46, %v1115_v46  ;;  %v1231_v0 = vadd.f32 %v1230_v16, %v3823_v20  ;;  %2062 = vrot.lane.b32.xlu0 %v2772_v26, %s3187_s18  ;;  %v1232_v27 = vpop.f32.mrb[13].mxu1 }
 0x283   : > { %1711 = vst.msk [vmem:[%s3842_s16 + $0x18] sm:$0xf] %vm1560_vm0, %v3968_v49  ;;  %v3982_v18 = vpack.c.bf16 %v1117_v10, %v1117_v10  ;;  %v1233_v11 = vadd.f32 %v1232_v27, %v3826_v54  ;;  %v1234_v55 = vpop.f32.mrb[14].mxu1 }
 0x284   : > { %1568 = vst.msk [vmem:[%s3835_s15 + $0x1c] sm:$0xf] %vm1560_vm0, %v3974_v7  ;;  %v3988_v57 = vpack.c.bf16 %v1231_v0, %v1231_v0  ;;  %v1235_v35 = vadd.f32 %v1234_v55, %v3823_v20  ;;  %1935 = vrot.lane.b32.xlu1 %v3896_v60, %s3187_s18  ;;  %v1236_v14 = vpop.f32.mrb[15].mxu1 }
 0x285   : > { %1712 = vst.msk [vmem:[%s3842_s16 + $0x1c] sm:$0xf] %vm1560_vm0, %v3982_v18  ;;  %v3996_v21 = vpack.c.bf16 %v1233_v11, %v1233_v11  ;;  %v1237_v25 = vadd.f32 %v1236_v14, %v3826_v54  ;;  %v1120_v58 = vpop.f32.mrb[16].mxu0 }
 0x286   : > { %1591 = vst.msk [vmem:[%s3835_s15 + $0x78] sm:$0xf] %vm1560_vm0, %v3988_v57  ;;  %v4002_v52 = vpack.c.bf16 %v1235_v35, %v1235_v35  ;;  %v1121_v29 = vadd.f32 %v1120_v58, %v3823_v20  ;;  %1889 = vrot.lane.b32.xlu0 %v3908_v6, %s3187_s18  ;;  %v1122_v48 = vpop.f32.mrb[17].mxu0 }
 0x287   : > { %1735 = vst.msk [vmem:[%s3842_s16 + $0x78] sm:$0xf] %vm1560_vm0, %v3996_v21  ;;  %v4013_v12 = vpack.c.bf16 %v1237_v25, %v1237_v25  ;;  %v1123_v51 = vadd.f32 %v1122_v48, %v3826_v54  ;;  %v1124_v62 = vpop.f32.mrb[18].mxu0 }
 0x288   : > { %1592 = vst.msk [vmem:[%s3835_s15 + $0x7c] sm:$0xf] %vm1560_vm0, %v4002_v52  ;;  %v4019_v33 = vpack.c.bf16 %v1121_v29, %v1121_v29  ;;  %v1125_v26 = vadd.f32 %v1124_v62, %v3823_v20  ;;  %2016 = vrot.lane.b32.xlu1 %v3882_v34, %s3187_s18  ;;  %v1126_v30 = vpop.f32.mrb[19].mxu0 }
 0x289   : > { %1736 = vst.msk [vmem:[%s3842_s16 + $0x7c] sm:$0xf] %vm1560_vm0, %v4013_v12  ;;  %v4027_v2 = vpack.c.bf16 %v1123_v51, %v1123_v51  ;;  %v1127_v23 = vadd.f32 %v1126_v30, %v3826_v54  ;;  %v2852_v60 = vpop.f32.mrb[16].mxu1 }
 0x28a   : > { %1569 = vst.msk [vmem:[%s3835_s15 + $0x20] sm:$0xf] %vm1560_vm0, %v4019_v33  ;;  %v4033_v43 = vpack.c.bf16 %v1125_v26, %v1125_v26  ;;  %v1282_v13 = vadd.f32 %v2852_v60, %v4008_v17  ;;  %1937 = vrot.lane.b32.xlu0 %v3934_v37, %s3187_s18  ;;  %v1273_v34 = vpop.f32.mrb[17].mxu1 }
 0x28b   : > { %1713 = vst.msk [vmem:[%s3842_s16 + $0x20] sm:$0xf] %vm1560_vm0, %v4027_v2  ;;  %v4041_v5 = vpack.c.bf16 %v1127_v23, %v1127_v23  ;;  %v1274_v50 = vadd.f32 %v1273_v34, %v4008_v17  ;;  %v2853_v6 = vpop.f32.mrb[18].mxu1 }
 0x28c   : > { %1570 = vst.msk [vmem:[%s3835_s15 + $0x24] sm:$0xf] %vm1560_vm0, %v4033_v43  ;;  %v4053_v39 = vpack.c.bf16 %v1282_v13, %v1282_v13  ;;  %v1285_v31 = vadd.f32 %v2853_v6, %v4008_v17  ;;  %2064 = vrot.lane.b32.xlu1 %v3902_v3, %s3187_s18  ;;  %v1276_v59 = vpop.f32.mrb[19].mxu1 }
 0x28d   : > { %1714 = vst.msk [vmem:[%s3842_s16 + $0x24] sm:$0xf] %vm1560_vm0, %v4041_v5  ;;  %v4061_v22 = vpack.c.bf16 %v1274_v50, %v1274_v50  ;;  %v1277_v15 = vadd.f32 %v1276_v59, %v4008_v17  ;;  %v1130_v32 = vpop.f32.mrb[20].mxu0 }
 0x28e   : > { %1851 = vst.msk [vmem:[%s4047_s17 + $0x8] sm:$0xf] %vm1560_vm0, %v4053_v39  ;;  %v4067_v61 = vpack.c.bf16 %v1285_v31, %v1285_v31  ;;  %v1131_v42 = vadd.f32 %v1130_v32, %v3823_v20  ;;  %2018 = vrot.lane.b32.xlu0 %v3915_v28, %s3187_s18  ;;  %v1132_v3 = vpop.f32.mrb[21].mxu0 }
 0x28f   : > { %1849 = vst.msk [vmem:[%s4047_s17] sm:$0xf] %vm1560_vm0, %v4061_v22  ;;  %v4075_v37 = vpack.c.bf16 %v1277_v15, %v1277_v15  ;;  %v1133_v56 = vadd.f32 %v1132_v3, %v3826_v54  ;;  %v1134_v41 = vpop.f32.mrb[22].mxu0 }
 0x290   : > { %1852 = vst.msk [vmem:[%s4047_s17 + $0xc] sm:$0xf] %vm1560_vm0, %v4067_v61  ;;  %v4081_v47 = vpack.c.bf16 %v1131_v42, %v1131_v42  ;;  %v1135_v63 = vadd.f32 %v1134_v41, %v3823_v20  ;;  %1891 = vrot.lane.b32.xlu1 %v3921_v4, %s3187_s18  ;;  %v1136_v28 = vpop.f32.mrb[23].mxu0 }
 0x291   : > { %1850 = vst.msk [vmem:[%s4047_s17 + $0x4] sm:$0xf] %vm1560_vm0, %v4075_v37  ;;  %v4089_v19 = vpack.c.bf16 %v1133_v56, %v1133_v56  ;;  %v1137_v45 = vadd.f32 %v1136_v28, %v3826_v54  ;;  %v2856_v38 = vpop.f32.mrb[20].mxu1 }
 0x292   : > { %1571 = vst.msk [vmem:[%s3835_s15 + $0x28] sm:$0xf] %vm1560_vm0, %v4081_v47  ;;  %v4095_v44 = vpack.c.bf16 %v1135_v63, %v1135_v63  ;;  %v1298_v46 = vadd.f32 %v2856_v38, %v4008_v17  ;;  %2066 = vrot.lane.b32.xlu0 %v3941_v53, %s3187_s18  ;;  %v1289_v4 = vpop.f32.mrb[21].mxu1 }
 0x293   : > { %1715 = vst.msk [vmem:[%s3842_s16 + $0x28] sm:$0xf] %vm1560_vm0, %v4089_v19  ;;  %v4103_v40 = vpack.c.bf16 %v1137_v45, %v1137_v45  ;;  %v1290_v10 = vadd.f32 %v1289_v4, %v4008_v17  ;;  %v2857_v16 = vpop.f32.mrb[22].mxu1 }
 0x294   : > { %1572 = vst.msk [vmem:[%s3835_s15 + $0x2c] sm:$0xf] %vm1560_vm0, %v4095_v44  ;;  %v4109_v0 = vpack.c.bf16 %v1298_v46, %v1298_v46  ;;  %v1301_v27 = vadd.f32 %v2857_v16, %v4008_v17  ;;  %1939 = vrot.lane.b32.xlu1 %v3947_v8, %s3187_s18  ;;  %v1292_v53 = vpop.f32.mrb[23].mxu1 }
 0x295   : > { %1716 = vst.msk [vmem:[%s3842_s16 + $0x2c] sm:$0xf] %vm1560_vm0, %v4103_v40  ;;  %v4117_v1 = vpack.c.bf16 %v1290_v10, %v1290_v10  ;;  %v1293_v11 = vadd.f32 %v1292_v53, %v4008_v17  ;;  %v1140_v55 = vpop.f32.mrb[24].mxu0 }
 0x296   : > { %1855 = vst.msk [vmem:[%s4047_s17 + $0x18] sm:$0xf] %vm1560_vm0, %v4109_v0  ;;  %v4123_v35 = vpack.c.bf16 %v1301_v27, %v1301_v27  ;;  %v1141_v14 = vadd.f32 %v1140_v55, %v3823_v20  ;;  %1893 = vrot.lane.b32.xlu0 %v3960_v9, %s3187_s18  ;;  %v1142_v8 = vpop.f32.mrb[25].mxu0 }
 0x297   : > { %1853 = vst.msk [vmem:[%s4047_s17 + $0x10] sm:$0xf] %vm1560_vm0, %v4117_v1  ;;  %v4131_v25 = vpack.c.bf16 %v1293_v11, %v1293_v11  ;;  %v1143_v58 = vadd.f32 %v1142_v8, %v3826_v54  ;;  %v1144_v29 = vpop.f32.mrb[26].mxu0 }
 0x298   : > { %1856 = vst.msk [vmem:[%s4047_s17 + $0x1c] sm:$0xf] %vm1560_vm0, %v4123_v35  ;;  %v4137_v48 = vpack.c.bf16 %v1141_v14, %v1141_v14  ;;  %v1145_v51 = vadd.f32 %v1144_v29, %v3823_v20  ;;  %2020 = vrot.lane.b32.xlu1 %v3928_v36, %s3187_s18  ;;  %v1146_v9 = vpop.f32.mrb[27].mxu0 }
 0x299   : > { %1854 = vst.msk [vmem:[%s4047_s17 + $0x14] sm:$0xf] %vm1560_vm0, %v4131_v25  ;;  %v4145_v62 = vpack.c.bf16 %v1143_v58, %v1143_v58  ;;  %v1147_v26 = vadd.f32 %v1146_v9, %v3826_v54  ;;  %v2860_v30 = vpop.f32.mrb[24].mxu1 }
 0x29a   : > { %1573 = vst.msk [vmem:[%s3835_s15 + $0x30] sm:$0xf] %vm1560_vm0, %v4137_v48  ;;  %v4151_v23 = vpack.c.bf16 %v1145_v51, %v1145_v51  ;;  %v1314_v60 = vadd.f32 %v2860_v30, %v4008_v17  ;;  %1941 = vrot.lane.b32.xlu0 %v3988_v57, %s3187_s18  ;;  %v1305_v36 = vpop.f32.mrb[25].mxu1 }
 0x29b   : > { %1717 = vst.msk [vmem:[%s3842_s16 + $0x30] sm:$0xf] %vm1560_vm0, %v4145_v62  ;;  %v4159_v13 = vpack.c.bf16 %v1147_v26, %v1147_v26  ;;  %v1306_v34 = vadd.f32 %v1305_v36, %v4008_v17  ;;  %v2861_v50 = vpop.f32.mrb[26].mxu1 }
 0x29c   : > { %1574 = vst.msk [vmem:[%s3835_s15 + $0x34] sm:$0xf] %vm1560_vm0, %v4151_v23  ;;  %v4165_v6 = vpack.c.bf16 %v1314_v60, %v1314_v60  ;;  %v1317_v31 = vadd.f32 %v2861_v50, %v4008_v17  ;;  %2068 = vrot.lane.b32.xlu1 %v3954_v24, %s3187_s18  ;;  %v1308_v57 = vpop.f32.mrb[27].mxu1 }
 0x29d   : > { %1718 = vst.msk [vmem:[%s3842_s16 + $0x34] sm:$0xf] %vm1560_vm0, %v4159_v13  ;;  %v4173_v59 = vpack.c.bf16 %v1306_v34, %v1306_v34  ;;  %v1309_v15 = vadd.f32 %v1308_v57, %v4008_v17  ;;  %v1150_v32 = vpop.f32.mrb[28].mxu0 }
 0x29e   : > { %1859 = vst.msk [vmem:[%s4047_s17 + $0x28] sm:$0xf] %vm1560_vm0, %v4165_v6  ;;  %v4179_v42 = vpack.c.bf16 %v1317_v31, %v1317_v31  ;;  %v1151_v3 = vadd.f32 %v1150_v32, %v3823_v20  ;;  %2022 = vrot.lane.b32.xlu0 %v3968_v49, %s3187_s18  ;;  %v1152_v24 = vpop.f32.mrb[29].mxu0 }
 0x29f   : > { %1857 = vst.msk [vmem:[%s4047_s17 + $0x20] sm:$0xf] %vm1560_vm0, %v4173_v59  ;;  %v4187_v56 = vpack.c.bf16 %v1309_v15, %v1309_v15  ;;  %v1153_v41 = vadd.f32 %v1152_v24, %v3826_v54  ;;  %v1154_v63 = vpop.f32.mrb[30].mxu0 }
 0x2a0   : > { %1860 = vst.msk [vmem:[%s4047_s17 + $0x2c] sm:$0xf] %vm1560_vm0, %v4179_v42  ;;  %v4193_v28 = vpack.c.bf16 %v1151_v3, %v1151_v3  ;;  %v1155_v45 = vadd.f32 %v1154_v63, %v3823_v20  ;;  %1895 = vrot.lane.b32.xlu1 %v3974_v7, %s3187_s18  ;;  %v1156_v49 = vpop.f32.mrb[31].mxu0 }
 0x2a1   : > { %1858 = vst.msk [vmem:[%s4047_s17 + $0x24] sm:$0xf] %vm1560_vm0, %v4187_v56  ;;  %v4201_v38 = vpack.c.bf16 %v1153_v41, %v1153_v41  ;;  %v1157_v46 = vadd.f32 %v1156_v49, %v3826_v54  ;;  %v2864_v4 = vpop.f32.mrb[28].mxu1 }
 0x2a2   : > { %1575 = vst.msk [vmem:[%s3835_s15 + $0x38] sm:$0xf] %vm1560_vm0, %v4193_v28  ;;  %v4207_v10 = vpack.c.bf16 %v1155_v45, %v1155_v45  ;;  %v1330_v16 = vadd.f32 %v2864_v4, %v4008_v17  ;;  %2070 = vrot.lane.b32.xlu0 %v3996_v21, %s3187_s18  ;;  %v1321_v7 = vpop.f32.mrb[29].mxu1 }
 0x2a3   : > { %1719 = vst.msk [vmem:[%s3842_s16 + $0x38] sm:$0xf] %vm1560_vm0, %v4201_v38  ;;  %v4215_v27 = vpack.c.bf16 %v1157_v46, %v1157_v46  ;;  %v1322_v53 = vadd.f32 %v1321_v7, %v4008_v17  ;;  %v2865_v11 = vpop.f32.mrb[30].mxu1 }
 0x2a4   : > { %1576 = vst.msk [vmem:[%s3835_s15 + $0x3c] sm:$0xf] %vm1560_vm0, %v4207_v10  ;;  %v4221_v55 = vpack.c.bf16 %v1330_v16, %v1330_v16  ;;  %v1333_v14 = vadd.f32 %v2865_v11, %v4008_v17  ;;  %1943 = vrot.lane.b32.xlu1 %v4002_v52, %s3187_s18  ;;  %v1324_v21 = vpop.f32.mrb[31].mxu1 }
 0x2a5   : > { %1720 = vst.msk [vmem:[%s3842_s16 + $0x3c] sm:$0xf] %vm1560_vm0, %v4215_v27  ;;  %v4229_v8 = vpack.c.bf16 %v1322_v53, %v1322_v53  ;;  %v1325_v58 = vadd.f32 %v1324_v21, %v4008_v17  ;;  %v1160_v29 = vpop.f32.mrb[32].mxu0 }
 0x2a6   : > { %1863 = vst.msk [vmem:[%s4047_s17 + $0x38] sm:$0xf] %vm1560_vm0, %v4221_v55  ;;  %v4235_v51 = vpack.c.bf16 %v1333_v14, %v1333_v14  ;;  %v1161_v9 = vadd.f32 %v1160_v29, %v3823_v20  ;;  %1897 = vrot.lane.b32.xlu0 %v4019_v33, %s3187_s18  ;;  %v1162_v52 = vpop.f32.mrb[33].mxu0 }
 0x2a7   : > { %1861 = vst.msk [vmem:[%s4047_s17 + $0x30] sm:$0xf] %vm1560_vm0, %v4229_v8  ;;  %v4243_v26 = vpack.c.bf16 %v1325_v58, %v1325_v58  ;;  %v1163_v30 = vadd.f32 %v1162_v52, %v3826_v54  ;;  %v1164_v60 = vpop.f32.mrb[34].mxu0 }
 0x2a8   : > { %1864 = vst.msk [vmem:[%s4047_s17 + $0x3c] sm:$0xf] %vm1560_vm0, %v4235_v51  ;;  %v4249_v36 = vpack.c.bf16 %v1161_v9, %v1161_v9  ;;  %v1165_v34 = vadd.f32 %v1164_v60, %v3823_v20  ;;  %2024 = vrot.lane.b32.xlu1 %v3982_v18, %s3187_s18  ;;  %v1166_v33 = vpop.f32.mrb[35].mxu0 }
 0x2a9   : > { %1862 = vst.msk [vmem:[%s4047_s17 + $0x34] sm:$0xf] %vm1560_vm0, %v4243_v26  ;;  %v4257_v50 = vpack.c.bf16 %v1163_v30, %v1163_v30  ;;  %v1167_v31 = vadd.f32 %v1166_v33, %v3826_v54  ;;  %v2868_v57 = vpop.f32.mrb[32].mxu1 }
 0x2aa   : > { %1577 = vst.msk [vmem:[%s3835_s15 + $0x40] sm:$0xf] %vm1560_vm0, %v4249_v36  ;;  %v4263_v15 = vpack.c.bf16 %v1165_v34, %v1165_v34  ;;  %v1346_v32 = vadd.f32 %v2868_v57, %v4008_v17  ;;  %2143 = vrot.lane.b32.xlu0 %v4053_v39, %s3187_s18  ;;  %v1337_v18 = vpop.f32.mrb[33].mxu1 }
 0x2ab   : > { %1721 = vst.msk [vmem:[%s3842_s16 + $0x40] sm:$0xf] %vm1560_vm0, %v4257_v50  ;;  %v4271_v3 = vpack.c.bf16 %v1167_v31, %v1167_v31  ;;  %v1338_v24 = vadd.f32 %v1337_v18, %v4008_v17  ;;  %v2869_v41 = vpop.f32.mrb[34].mxu1 }
 0x2ac   : > { %1578 = vst.msk [vmem:[%s3835_s15 + $0x44] sm:$0xf] %vm1560_vm0, %v4263_v15  ;;  %v4277_v63 = vpack.c.bf16 %v1346_v32, %v1346_v32  ;;  %v1349_v45 = vadd.f32 %v2869_v41, %v4008_v17  ;;  %2072 = vrot.lane.b32.xlu1 %v4013_v12, %s3187_s18  ;;  %v1340_v39 = vpop.f32.mrb[35].mxu1 }
 0x2ad   : > { %1722 = vst.msk [vmem:[%s3842_s16 + $0x44] sm:$0xf] %vm1560_vm0, %v4271_v3  ;;  %v4285_v49 = vpack.c.bf16 %v1338_v24, %v1338_v24  ;;  %v1341_v46 = vadd.f32 %v1340_v39, %v4008_v17  ;;  %v1170_v4 = vpop.f32.mrb[36].mxu0 }
 0x2ae   : > { %1867 = vst.msk [vmem:[%s4047_s17 + $0x48] sm:$0xf] %vm1560_vm0, %v4277_v63  ;;  %v4291_v16 = vpack.c.bf16 %v1349_v45, %v1349_v45  ;;  %v1171_v7 = vadd.f32 %v1170_v4, %v3823_v20  ;;  %2026 = vrot.lane.b32.xlu0 %v4027_v2, %s3187_s18  ;;  %v1172_v12 = vpop.f32.mrb[37].mxu0 }
 0x2af   : > { %1865 = vst.msk [vmem:[%s4047_s17 + $0x40] sm:$0xf] %vm1560_vm0, %v4285_v49  ;;  %v4299_v53 = vpack.c.bf16 %v1341_v46, %v1341_v46  ;;  %v1173_v11 = vadd.f32 %v1172_v12, %v3826_v54  ;;  %v1174_v14 = vpop.f32.mrb[38].mxu0 }
 0x2b0   : > { %1868 = vst.msk [vmem:[%s4047_s17 + $0x4c] sm:$0xf] %vm1560_vm0, %v4291_v16  ;;  %v4305_v21 = vpack.c.bf16 %v1171_v7, %v1171_v7  ;;  %v1175_v58 = vadd.f32 %v1174_v14, %v3823_v20  ;;  %1899 = vrot.lane.b32.xlu1 %v4033_v43, %s3187_s18  ;;  %v1176_v2 = vpop.f32.mrb[39].mxu0 }
 0x2b1   : > { %1866 = vst.msk [vmem:[%s4047_s17 + $0x44] sm:$0xf] %vm1560_vm0, %v4299_v53  ;;  %v4313_v29 = vpack.c.bf16 %v1173_v11, %v1173_v11  ;;  %v1177_v9 = vadd.f32 %v1176_v2, %v3826_v54  ;;  %v2872_v52 = vpop.f32.mrb[36].mxu1 }
 0x2b2   : > { %1579 = vst.msk [vmem:[%s3835_s15 + $0x48] sm:$0xf] %vm1560_vm0, %v4305_v21  ;;  %v4319_v30 = vpack.c.bf16 %v1175_v58, %v1175_v58  ;;  %v1362_v60 = vadd.f32 %v2872_v52, %v4008_v17  ;;  %2139 = vrot.lane.b32.xlu0 %v4061_v22, %s3187_s18  ;;  %v1353_v43 = vpop.f32.mrb[37].mxu1 }
 0x2b3   : > { %1723 = vst.msk [vmem:[%s3842_s16 + $0x48] sm:$0xf] %vm1560_vm0, %v4313_v29  ;;  %v4327_v34 = vpack.c.bf16 %v1177_v9, %v1177_v9  ;;  %v1354_v33 = vadd.f32 %v1353_v43, %v4008_v17  ;;  %v2873_v31 = vpop.f32.mrb[38].mxu1 }
 0x2b4   : > { %1580 = vst.msk [vmem:[%s3835_s15 + $0x4c] sm:$0xf] %vm1560_vm0, %v4319_v30  ;;  %v4333_v57 = vpack.c.bf16 %v1362_v60, %v1362_v60  ;;  %v1365_v32 = vadd.f32 %v2873_v31, %v4008_v17  ;;  %2145 = vrot.lane.b32.xlu1 %v4067_v61, %s3187_s18  ;;  %v1356_v22 = vpop.f32.mrb[39].mxu1 }
 0x2b5   : > { %1724 = vst.msk [vmem:[%s3842_s16 + $0x4c] sm:$0xf] %vm1560_vm0, %v4327_v34  ;;  %v4341_v18 = vpack.c.bf16 %v1354_v33, %v1354_v33  ;;  %v1357_v24 = vadd.f32 %v1356_v22, %v4008_v17  ;;  %v1180_v41 = vpop.f32.mrb[40].mxu0 }
 0x2b6   : > { %1871 = vst.msk [vmem:[%s4047_s17 + $0x58] sm:$0xf] %vm1560_vm0, %v4333_v57  ;;  %v4347_v45 = vpack.c.bf16 %v1365_v32, %v1365_v32  ;;  %v1181_v39 = vadd.f32 %v1180_v41, %v3823_v20  ;;  %1901 = vrot.lane.b32.xlu0 %v4081_v47, %s3187_s18  ;;  %v1182_v61 = vpop.f32.mrb[41].mxu0 }
 0x2b7   : > { %1869 = vst.msk [vmem:[%s4047_s17 + $0x50] sm:$0xf] %vm1560_vm0, %v4341_v18  ;;  %v4355_v46 = vpack.c.bf16 %v1357_v24, %v1357_v24  ;;  %v1183_v4 = vadd.f32 %v1182_v61, %v3826_v54  ;;  %v1184_v7 = vpop.f32.mrb[42].mxu0 }
 0x2b8   : > { %1872 = vst.msk [vmem:[%s4047_s17 + $0x5c] sm:$0xf] %vm1560_vm0, %v4347_v45  ;;  %v4361_v12 = vpack.c.bf16 %v1181_v39, %v1181_v39  ;;  %v1185_v11 = vadd.f32 %v1184_v7, %v3823_v20  ;;  %2028 = vrot.lane.b32.xlu1 %v4041_v5, %s3187_s18  ;;  %v1186_v47 = vpop.f32.mrb[43].mxu0 }
 0x2b9   : > { %1870 = vst.msk [vmem:[%s4047_s17 + $0x54] sm:$0xf] %vm1560_vm0, %v4355_v46  ;;  %v4369_v14 = vpack.c.bf16 %v1183_v4, %v1183_v4  ;;  %v1187_v58 = vadd.f32 %v1186_v47, %v3826_v54  ;;  %v2876_v2 = vpop.f32.mrb[40].mxu1 }
 0x2ba   : > { %1581 = vst.msk [vmem:[%s3835_s15 + $0x50] sm:$0xf] %vm1560_vm0, %v4361_v12  ;;  %v4375_v9 = vpack.c.bf16 %v1185_v11, %v1185_v11  ;;  %v1378_v52 = vadd.f32 %v2876_v2, %v4008_v17  ;;  %2151 = vrot.lane.b32.xlu0 %v4109_v0, %s3187_s18  ;;  %v1369_v5 = vpop.f32.mrb[41].mxu1 }
 0x2bb   : > { %1725 = vst.msk [vmem:[%s3842_s16 + $0x50] sm:$0xf] %vm1560_vm0, %v4369_v14  ;;  %v4383_v60 = vpack.c.bf16 %v1187_v58, %v1187_v58  ;;  %v1370_v43 = vadd.f32 %v1369_v5, %v4008_v17  ;;  %v2877_v33 = vpop.f32.mrb[42].mxu1 }
 0x2bc   : > { %1582 = vst.msk [vmem:[%s3835_s15 + $0x54] sm:$0xf] %vm1560_vm0, %v4375_v9  ;;  %v4389_v31 = vpack.c.bf16 %v1378_v52, %v1378_v52  ;;  %v1381_v32 = vadd.f32 %v2877_v33, %v4008_v17  ;;  %2141 = vrot.lane.b32.xlu1 %v4075_v37, %s3187_s18  ;;  %v1372_v0 = vpop.f32.mrb[43].mxu1 }
 0x2bd   : > { %1726 = vst.msk [vmem:[%s3842_s16 + $0x54] sm:$0xf] %vm1560_vm0, %v4383_v60  ;;  %v4397_v22 = vpack.c.bf16 %v1370_v43, %v1370_v43  ;;  %v1373_v24 = vadd.f32 %v1372_v0, %v4008_v17  ;;  %v1190_v41 = vpop.f32.mrb[44].mxu0 }
 0x2be   : > { %1875 = vst.msk [vmem:[%s4047_s17 + $0x68] sm:$0xf] %vm1560_vm0, %v4389_v31  ;;  %v4403_v39 = vpack.c.bf16 %v1381_v32, %v1381_v32  ;;  %v1191_v61 = vadd.f32 %v1190_v41, %v3823_v20  ;;  %2030 = vrot.lane.b32.xlu0 %v4089_v19, %s3187_s18  ;;  %v1192_v37 = vpop.f32.mrb[45].mxu0 }
 0x2bf   : > { %1873 = vst.msk [vmem:[%s4047_s17 + $0x60] sm:$0xf] %vm1560_vm0, %v4397_v22  ;;  %v4411_v4 = vpack.c.bf16 %v1373_v24, %v1373_v24  ;;  %v1193_v7 = vadd.f32 %v1192_v37, %v3826_v54  ;;  %v1194_v11 = vpop.f32.mrb[46].mxu0 }
 0x2c0   : > { %1876 = vst.msk [vmem:[%s4047_s17 + $0x6c] sm:$0xf] %vm1560_vm0, %v4403_v39  ;;  %v4417_v47 = vpack.c.bf16 %v1191_v61, %v1191_v61  ;;  %v1195_v58 = vadd.f32 %v1194_v11, %v3823_v20  ;;  %1903 = vrot.lane.b32.xlu1 %v4095_v44, %s3187_s18  ;;  %v1196_v19 = vpop.f32.mrb[47].mxu0 }
 0x2c1   : > { %1874 = vst.msk [vmem:[%s4047_s17 + $0x64] sm:$0xf] %vm1560_vm0, %v4411_v4  ;;  %v4425_v2 = vpack.c.bf16 %v1193_v7, %v1193_v7  ;;  %v1197_v52 = vadd.f32 %v1196_v19, %v3826_v54  ;;  %v2880_v5 = vpop.f32.mrb[44].mxu1 }
 0x2c2   : > { %1583 = vst.msk [vmem:[%s3835_s15 + $0x58] sm:$0xf] %vm1560_vm0, %v4417_v47  ;;  %v4431_v43 = vpack.c.bf16 %v1195_v58, %v1195_v58  ;;  %v1394_v20 = vadd.f32 %v2880_v5, %v4008_v17  ;;  %2147 = vrot.lane.b32.xlu0 %v4117_v1, %s3187_s18  ;;  %v1385_v44 = vpop.f32.mrb[45].mxu1 }
 0x2c3   : > { %1727 = vst.msk [vmem:[%s3842_s16 + $0x58] sm:$0xf] %vm1560_vm0, %v4425_v2  ;;  %v4439_v33 = vpack.c.bf16 %v1197_v52, %v1197_v52  ;;  %v1386_v54 = vadd.f32 %v1385_v44, %v4008_v17  ;;  %v2881_v32 = vpop.f32.mrb[46].mxu1 }
 0x2c4   : > { %1584 = vst.msk [vmem:[%s3835_s15 + $0x5c] sm:$0xf] %vm1560_vm0, %v4431_v43  ;;  %v4445_v0 = vpack.c.bf16 %v1394_v20, %v1394_v20  ;;  %v1397_v24 = vadd.f32 %v2881_v32, %v4008_v17  ;;  %2153 = vrot.lane.b32.xlu1 %v4123_v35, %s3187_s18  ;;  %v1388_v1 = vpop.f32.mrb[47].mxu1 }
 0x2c5   : > { %1728 = vst.msk [vmem:[%s3842_s16 + $0x5c] sm:$0xf] %vm1560_vm0, %v4439_v33  ;;  %v4453_v41 = vpack.c.bf16 %v1386_v54, %v1386_v54  ;;  %v1389_v61 = vadd.f32 %v1388_v1, %v4008_v17 }
 0x2c6   : > { %1879 = vst.msk [vmem:[%s4047_s17 + $0x78] sm:$0xf] %vm1560_vm0, %v4445_v0  ;;  %v4459_v37 = vpack.c.bf16 %v1397_v24, %v1397_v24  ;;  %1905 = vrot.lane.b32.xlu0 %v4137_v48, %s3187_s18 }
 0x2c7   : > { %1877 = vst.msk [vmem:[%s4047_s17 + $0x70] sm:$0xf] %vm1560_vm0, %v4453_v41  ;;  %v4466_v35 = vpack.c.bf16 %v1389_v61, %v1389_v61 }
 0x2c8   : > { %1880 = vst.msk [vmem:[%s4047_s17 + $0x7c] sm:$0xf] %vm1560_vm0, %v4459_v37  ;;  %2032 = vrot.lane.b32.xlu1 %v4103_v40, %s3187_s18 }
 0x2c9   : > { %1878 = vst.msk [vmem:[%s4047_s17 + $0x74] sm:$0xf] %vm1560_vm0, %v4466_v35 }
 0x2ca   : > { %2159 = vrot.lane.b32.xlu0 %v4165_v6, %s3187_s18 }
 0x2cc   : > { %2149 = vrot.lane.b32.xlu1 %v4131_v25, %s3187_s18 }
 0x2ce   : > { %2034 = vrot.lane.b32.xlu0 %v4145_v62, %s3187_s18 }
 0x2d0   : > { %1907 = vrot.lane.b32.xlu1 %v4151_v23, %s3187_s18 }
 0x2d2   : > { %2155 = vrot.lane.b32.xlu0 %v4173_v59, %s3187_s18 }
 0x2d4   : > { %2161 = vrot.lane.b32.xlu1 %v4179_v42, %s3187_s18 }
 0x2d6   : > { %1909 = vrot.lane.b32.xlu0 %v4193_v28, %s3187_s18 }
 0x2d8   : > { %2036 = vrot.lane.b32.xlu1 %v4159_v13, %s3187_s18 }
 0x2da   : > { %2167 = vrot.lane.b32.xlu0 %v4221_v55, %s3187_s18 }
 0x2dc   : > { %2157 = vrot.lane.b32.xlu1 %v4187_v56, %s3187_s18  ;;  %v1882_v17 = vpop.permute.xlu0 %1881 }
 0x2dd   : > { %2612 = vst.msk [vmem:[%s3835_s15 + $0x80] sm:$0xf] %vm1560_vm0, %v1882_v17 }
 0x2de   : > { %v1884_v40 = vpop.permute.xlu1 %1883  ;;  %2038 = vrot.lane.b32.xlu0 %v4201_v38, %s3187_s18 }
 0x2df   : > { %2613 = vst.msk [vmem:[%s3835_s15 + $0x84] sm:$0xf] %vm1560_vm0, %v1884_v40 }
 0x2e0   : > { %1911 = vrot.lane.b32.xlu1 %v4207_v10, %s3187_s18  ;;  %v1930_v25 = vpop.permute.xlu0 %1929 }
 0x2e1   : > { %2636 = vst.msk [vmem:[%s3835_s15 + $0xe0] sm:$0xf] %vm1560_vm0, %v1930_v25 }
 0x2e2   : > { %v1932_v48 = vpop.permute.xlu1 %1931  ;;  %2163 = vrot.lane.b32.xlu0 %v4229_v8, %s3187_s18 }
 0x2e3   : > { %2637 = vst.msk [vmem:[%s3835_s15 + $0xe4] sm:$0xf] %vm1560_vm0, %v1932_v48 }
 0x2e4   : > { %2169 = vrot.lane.b32.xlu1 %v4235_v51, %s3187_s18  ;;  %v2011_v62 = vpop.permute.xlu0 %2010 }
 0x2e5   : > { %2644 = vst.msk [vmem:[%s3842_s16 + $0x80] sm:$0xf] %vm1560_vm0, %v2011_v62 }
 0x2e6   : > { %v2013_v23 = vpop.permute.xlu1 %2012  ;;  %1913 = vrot.lane.b32.xlu0 %v4249_v36, %s3187_s18 }
 0x2e7   : > { %2645 = vst.msk [vmem:[%s3842_s16 + $0x84] sm:$0xf] %vm1560_vm0, %v2013_v23 }
 0x2e8   : > { %2040 = vrot.lane.b32.xlu1 %v4215_v27, %s3187_s18  ;;  %v2059_v13 = vpop.permute.xlu0 %2058 }
 0x2e9   : > { %2668 = vst.msk [vmem:[%s3842_s16 + $0xe0] sm:$0xf] %vm1560_vm0, %v2059_v13 }
 0x2ea   : > { %v2061_v6 = vpop.permute.xlu1 %2060  ;;  %2175 = vrot.lane.b32.xlu0 %v4277_v63, %s3187_s18 }
 0x2eb   : > { %2669 = vst.msk [vmem:[%s3842_s16 + $0xe4] sm:$0xf] %vm1560_vm0, %v2061_v6 }
 0x2ec   : > { %2165 = vrot.lane.b32.xlu1 %v4243_v26, %s3187_s18  ;;  %v1934_v59 = vpop.permute.xlu0 %1933 }
 0x2ed   : > { %2638 = vst.msk [vmem:[%s3835_s15 + $0xe8] sm:$0xf] %vm1560_vm0, %v1934_v59 }
 0x2ee   : > { %v1886_v42 = vpop.permute.xlu1 %1885  ;;  %2042 = vrot.lane.b32.xlu0 %v4257_v50, %s3187_s18 }
 0x2ef   : > { %2614 = vst.msk [vmem:[%s3835_s15 + $0x88] sm:$0xf] %vm1560_vm0, %v1886_v42 }
 0x2f0   : > { %1915 = vrot.lane.b32.xlu1 %v4263_v15, %s3187_s18  ;;  %v2015_v56 = vpop.permute.xlu0 %2014 }
 0x2f1   : > { %2646 = vst.msk [vmem:[%s3842_s16 + $0x88] sm:$0xf] %vm1560_vm0, %v2015_v56 }
 0x2f2   : > { %v1888_v28 = vpop.permute.xlu1 %1887  ;;  %2171 = vrot.lane.b32.xlu0 %v4285_v49, %s3187_s18 }
 0x2f3   : > { %2615 = vst.msk [vmem:[%s3835_s15 + $0x8c] sm:$0xf] %vm1560_vm0, %v1888_v28 }
 0x2f4   : > { %2177 = vrot.lane.b32.xlu1 %v4291_v16, %s3187_s18  ;;  %v2063_v38 = vpop.permute.xlu0 %2062 }
 0x2f5   : > { %2670 = vst.msk [vmem:[%s3842_s16 + $0xe8] sm:$0xf] %vm1560_vm0, %v2063_v38 }
 0x2f6   : > { %v1936_v10 = vpop.permute.xlu1 %1935  ;;  %1917 = vrot.lane.b32.xlu0 %v4305_v21, %s3187_s18 }
 0x2f7   : > { %2639 = vst.msk [vmem:[%s3835_s15 + $0xec] sm:$0xf] %vm1560_vm0, %v1936_v10 }
 0x2f8   : > { %2044 = vrot.lane.b32.xlu1 %v4271_v3, %s3187_s18  ;;  %v1890_v27 = vpop.permute.xlu0 %1889 }
 0x2f9   : > { %2616 = vst.msk [vmem:[%s3835_s15 + $0x90] sm:$0xf] %vm1560_vm0, %v1890_v27 }
 0x2fa   : > { %v2017_v55 = vpop.permute.xlu1 %2016  ;;  %2183 = vrot.lane.b32.xlu0 %v4333_v57, %s3187_s18 }
 0x2fb   : > { %2647 = vst.msk [vmem:[%s3842_s16 + $0x8c] sm:$0xf] %vm1560_vm0, %v2017_v55 }
 0x2fc   : > { %2173 = vrot.lane.b32.xlu1 %v4299_v53, %s3187_s18  ;;  %v1938_v8 = vpop.permute.xlu0 %1937 }
 0x2fd   : > { %2640 = vst.msk [vmem:[%s3835_s15 + $0xf0] sm:$0xf] %vm1560_vm0, %v1938_v8 }
 0x2fe   : > { %v2065_v51 = vpop.permute.xlu1 %2064  ;;  %2046 = vrot.lane.b32.xlu0 %v4313_v29, %s3187_s18 }
 0x2ff   : > { %2671 = vst.msk [vmem:[%s3842_s16 + $0xec] sm:$0xf] %vm1560_vm0, %v2065_v51 }
 0x300   : > { %1919 = vrot.lane.b32.xlu1 %v4319_v30, %s3187_s18  ;;  %v2019_v26 = vpop.permute.xlu0 %2018 }
 0x301   : > { %2648 = vst.msk [vmem:[%s3842_s16 + $0x90] sm:$0xf] %vm1560_vm0, %v2019_v26 }
 0x302   : > { %v1892_v36 = vpop.permute.xlu1 %1891  ;;  %2179 = vrot.lane.b32.xlu0 %v4341_v18, %s3187_s18 }
 0x303   : > { %2617 = vst.msk [vmem:[%s3835_s15 + $0x94] sm:$0xf] %vm1560_vm0, %v1892_v36 }
 0x304   : > { %2185 = vrot.lane.b32.xlu1 %v4347_v45, %s3187_s18  ;;  %v2067_v50 = vpop.permute.xlu0 %2066 }
 0x305   : > { %2672 = vst.msk [vmem:[%s3842_s16 + $0xf0] sm:$0xf] %vm1560_vm0, %v2067_v50 }
 0x306   : > { %v1940_v15 = vpop.permute.xlu1 %1939  ;;  %1921 = vrot.lane.b32.xlu0 %v4361_v12, %s3187_s18 }
 0x307   : > { %2641 = vst.msk [vmem:[%s3835_s15 + $0xf4] sm:$0xf] %vm1560_vm0, %v1940_v15 }
 0x308   : > { %2048 = vrot.lane.b32.xlu1 %v4327_v34, %s3187_s18  ;;  %v1894_v3 = vpop.permute.xlu0 %1893 }
 0x309   : > { %2618 = vst.msk [vmem:[%s3835_s15 + $0x98] sm:$0xf] %vm1560_vm0, %v1894_v3 }
 0x30a   : > { %v2021_v63 = vpop.permute.xlu1 %2020  ;;  %2191 = vrot.lane.b32.xlu0 %v4389_v31, %s3187_s18 }
 0x30b   : > { %2649 = vst.msk [vmem:[%s3842_s16 + $0x94] sm:$0xf] %vm1560_vm0, %v2021_v63 }
 0x30c   : > { %2181 = vrot.lane.b32.xlu1 %v4355_v46, %s3187_s18  ;;  %v1942_v49 = vpop.permute.xlu0 %1941 }
 0x30d   : > { %2642 = vst.msk [vmem:[%s3835_s15 + $0xf8] sm:$0xf] %vm1560_vm0, %v1942_v49 }
 0x30e   : > { %v2069_v16 = vpop.permute.xlu1 %2068  ;;  %2050 = vrot.lane.b32.xlu0 %v4369_v14, %s3187_s18 }
 0x30f   : > { %2673 = vst.msk [vmem:[%s3842_s16 + $0xf4] sm:$0xf] %vm1560_vm0, %v2069_v16 }
 0x310   : > { %1923 = vrot.lane.b32.xlu1 %v4375_v9, %s3187_s18  ;;  %v2023_v53 = vpop.permute.xlu0 %2022 }
 0x311   : > { %2650 = vst.msk [vmem:[%s3842_s16 + $0x98] sm:$0xf] %vm1560_vm0, %v2023_v53 }
 0x312   : > { %v1896_v21 = vpop.permute.xlu1 %1895  ;;  %2187 = vrot.lane.b32.xlu0 %v4397_v22, %s3187_s18 }
 0x313   : > { %2619 = vst.msk [vmem:[%s3835_s15 + $0x9c] sm:$0xf] %vm1560_vm0, %v1896_v21 }
 0x314   : > { %2193 = vrot.lane.b32.xlu1 %v4403_v39, %s3187_s18  ;;  %v2071_v29 = vpop.permute.xlu0 %2070 }
 0x315   : > { %2674 = vst.msk [vmem:[%s3842_s16 + $0xf8] sm:$0xf] %vm1560_vm0, %v2071_v29 }
 0x316   : > { %v1944_v30 = vpop.permute.xlu1 %1943  ;;  %1925 = vrot.lane.b32.xlu0 %v4417_v47, %s3187_s18 }
 0x317   : > { %2643 = vst.msk [vmem:[%s3835_s15 + $0xfc] sm:$0xf] %vm1560_vm0, %v1944_v30 }
 0x318   : > { %2052 = vrot.lane.b32.xlu1 %v4383_v60, %s3187_s18  ;;  %v1898_v34 = vpop.permute.xlu0 %1897 }
 0x319   : > { %2620 = vst.msk [vmem:[%s3835_s15 + $0xa0] sm:$0xf] %vm1560_vm0, %v1898_v34 }
 0x31a   : > { %v2025_v57 = vpop.permute.xlu1 %2024  ;;  %2054 = vrot.lane.b32.xlu0 %v4425_v2, %s3187_s18 }
 0x31b   : > { %2651 = vst.msk [vmem:[%s3842_s16 + $0x9c] sm:$0xf] %vm1560_vm0, %v2025_v57 }
 0x31c   : > { %2189 = vrot.lane.b32.xlu1 %v4411_v4, %s3187_s18  ;;  %v2144_v18 = vpop.permute.xlu0 %2143 }
 0x31d   : > { %2678 = vst.msk [vmem:[%s4047_s17 + $0x88] sm:$0xf] %vm1560_vm0, %v2144_v18 }
 0x31e   : > { %v2073_v45 = vpop.permute.xlu1 %2072  ;;  %2195 = vrot.lane.b32.xlu0 %v4453_v41, %s3187_s18 }
 0x31f   : > { %2675 = vst.msk [vmem:[%s3842_s16 + $0xfc] sm:$0xf] %vm1560_vm0, %v2073_v45 }
 0x320   : > { %1927 = vrot.lane.b32.xlu1 %v4431_v43, %s3187_s18  ;;  %v2027_v46 = vpop.permute.xlu0 %2026 }
 0x321   : > { %2652 = vst.msk [vmem:[%s3842_s16 + $0xa0] sm:$0xf] %vm1560_vm0, %v2027_v46 }
 0x322   : > { %v1900_v12 = vpop.permute.xlu1 %1899  ;;  %2199 = vrot.lane.b32.xlu0 %v4445_v0, %s3187_s18 }
 0x323   : > { %2621 = vst.msk [vmem:[%s3835_s15 + $0xa4] sm:$0xf] %vm1560_vm0, %v1900_v12 }
 0x324   : > { %2056 = vrot.lane.b32.xlu1 %v4439_v33, %s3187_s18  ;;  %v2140_v14 = vpop.permute.xlu0 %2139 }
 0x325   : > { %2676 = vst.msk [vmem:[%s4047_s17 + $0x80] sm:$0xf] %vm1560_vm0, %v2140_v14 }
 0x326   : > { %v2146_v9 = vpop.permute.xlu1 %2145 }
 0x327   : > { %2679 = vst.msk [vmem:[%s4047_s17 + $0x8c] sm:$0xf] %vm1560_vm0, %v2146_v9 }
 0x328   : > { %2197 = vrot.lane.b32.xlu1 %v4466_v35, %s3187_s18  ;;  %v1902_v60 = vpop.permute.xlu0 %1901 }
 0x329   : > { %2622 = vst.msk [vmem:[%s3835_s15 + $0xa8] sm:$0xf] %vm1560_vm0, %v1902_v60 }
 0x32a   : > { %v2029_v31 = vpop.permute.xlu1 %2028 }
 0x32b   : > { %2653 = vst.msk [vmem:[%s3842_s16 + $0xa4] sm:$0xf] %vm1560_vm0, %v2029_v31 }
 0x32c   : > { %2201 = vrot.lane.b32.xlu1 %v4459_v37, %s3187_s18  ;;  %v2152_v22 = vpop.permute.xlu0 %2151 }
 0x32d   : > { %2682 = vst.msk [vmem:[%s4047_s17 + $0x98] sm:$0xf] %vm1560_vm0, %v2152_v22 }
 0x32e   : > { %v2142_v39 = vpop.permute.xlu1 %2141 }
 0x32f   : > { %2677 = vst.msk [vmem:[%s4047_s17 + $0x84] sm:$0xf] %vm1560_vm0, %v2142_v39 }
 0x330   : > { %v2031_v4 = vpop.permute.xlu0 %2030 }
 0x331   : > { %2654 = vst.msk [vmem:[%s3842_s16 + $0xa8] sm:$0xf] %vm1560_vm0, %v2031_v4 }
 0x332   : > { %v1904_v7 = vpop.permute.xlu1 %1903 }
 0x333   : > { %2623 = vst.msk [vmem:[%s3835_s15 + $0xac] sm:$0xf] %vm1560_vm0, %v1904_v7 }
 0x334   : > { %v2148_v11 = vpop.permute.xlu0 %2147 }
 0x335   : > { %2680 = vst.msk [vmem:[%s4047_s17 + $0x90] sm:$0xf] %vm1560_vm0, %v2148_v11 }
 0x336   : > { %v2154_v47 = vpop.permute.xlu1 %2153 }
 0x337   : > { %2683 = vst.msk [vmem:[%s4047_s17 + $0x9c] sm:$0xf] %vm1560_vm0, %v2154_v47 }
 0x338   : > { %v1906_v58 = vpop.permute.xlu0 %1905 }
 0x339   : > { %2624 = vst.msk [vmem:[%s3835_s15 + $0xb0] sm:$0xf] %vm1560_vm0, %v1906_v58 }
 0x33a   : > { %v2033_v19 = vpop.permute.xlu1 %2032 }
 0x33b   : > { %2655 = vst.msk [vmem:[%s3842_s16 + $0xac] sm:$0xf] %vm1560_vm0, %v2033_v19 }
 0x33c   : > { %v2160_v2 = vpop.permute.xlu0 %2159 }
 0x33d   : > { %2686 = vst.msk [vmem:[%s4047_s17 + $0xa8] sm:$0xf] %vm1560_vm0, %v2160_v2 }
 0x33e   : > { %v2150_v52 = vpop.permute.xlu1 %2149 }
 0x33f   : > { %2681 = vst.msk [vmem:[%s4047_s17 + $0x94] sm:$0xf] %vm1560_vm0, %v2150_v52 }
 0x340   : > { %v2035_v5 = vpop.permute.xlu0 %2034 }
 0x341   : > { %2656 = vst.msk [vmem:[%s3842_s16 + $0xb0] sm:$0xf] %vm1560_vm0, %v2035_v5 }
 0x342   : > { %v1908_v43 = vpop.permute.xlu1 %1907 }
 0x343   : > { %2625 = vst.msk [vmem:[%s3835_s15 + $0xb4] sm:$0xf] %vm1560_vm0, %v1908_v43 }
 0x344   : > { %v2156_v20 = vpop.permute.xlu0 %2155 }
 0x345   : > { %2684 = vst.msk [vmem:[%s4047_s17 + $0xa0] sm:$0xf] %vm1560_vm0, %v2156_v20 }
 0x346   : > { %v2162_v44 = vpop.permute.xlu1 %2161 }
 0x347   : > { %2687 = vst.msk [vmem:[%s4047_s17 + $0xac] sm:$0xf] %vm1560_vm0, %v2162_v44 }
 0x348   : > { %v1910_v33 = vpop.permute.xlu0 %1909 }
 0x349   : > { %2626 = vst.msk [vmem:[%s3835_s15 + $0xb8] sm:$0xf] %vm1560_vm0, %v1910_v33 }
 0x34a   : > { %v2037_v54 = vpop.permute.xlu1 %2036 }
 0x34b   : > { %2657 = vst.msk [vmem:[%s3842_s16 + $0xb4] sm:$0xf] %vm1560_vm0, %v2037_v54 }
 0x34c   : > { %v2168_v32 = vpop.permute.xlu0 %2167 }
 0x34d   : > { %2690 = vst.msk [vmem:[%s4047_s17 + $0xb8] sm:$0xf] %vm1560_vm0, %v2168_v32 }
 0x34e   : > { %v2158_v0 = vpop.permute.xlu1 %2157 }
 0x34f   : > { %2685 = vst.msk [vmem:[%s4047_s17 + $0xa4] sm:$0xf] %vm1560_vm0, %v2158_v0 }
 0x350   : > { %v2039_v24 = vpop.permute.xlu0 %2038 }
 0x351   : > { %2658 = vst.msk [vmem:[%s3842_s16 + $0xb8] sm:$0xf] %vm1560_vm0, %v2039_v24 }
 0x352   : > { %v1912_v1 = vpop.permute.xlu1 %1911 }
 0x353   : > { %2627 = vst.msk [vmem:[%s3835_s15 + $0xbc] sm:$0xf] %vm1560_vm0, %v1912_v1 }
 0x354   : > { %v2164_v41 = vpop.permute.xlu0 %2163 }
 0x355   : > { %2688 = vst.msk [vmem:[%s4047_s17 + $0xb0] sm:$0xf] %vm1560_vm0, %v2164_v41 }
 0x356   : > { %v2170_v61 = vpop.permute.xlu1 %2169 }
 0x357   : > { %2691 = vst.msk [vmem:[%s4047_s17 + $0xbc] sm:$0xf] %vm1560_vm0, %v2170_v61 }
 0x358   : > { %v1914_v37 = vpop.permute.xlu0 %1913 }
 0x359   : > { %2628 = vst.msk [vmem:[%s3835_s15 + $0xc0] sm:$0xf] %vm1560_vm0, %v1914_v37 }
 0x35a   : > { %v2041_v35 = vpop.permute.xlu1 %2040 }
 0x35b   : > { %2659 = vst.msk [vmem:[%s3842_s16 + $0xbc] sm:$0xf] %vm1560_vm0, %v2041_v35 }
 0x35c   : > { %v2176_v17 = vpop.permute.xlu0 %2175 }
 0x35d   : > { %2694 = vst.msk [vmem:[%s4047_s17 + $0xc8] sm:$0xf] %vm1560_vm0, %v2176_v17 }
 0x35e   : > { %v2166_v40 = vpop.permute.xlu1 %2165 }
 0x35f   : > { %2689 = vst.msk [vmem:[%s4047_s17 + $0xb4] sm:$0xf] %vm1560_vm0, %v2166_v40 }
 0x360   : > { %v2043_v25 = vpop.permute.xlu0 %2042 }
 0x361   : > { %2660 = vst.msk [vmem:[%s3842_s16 + $0xc0] sm:$0xf] %vm1560_vm0, %v2043_v25 }
 0x362   : > { %v1916_v48 = vpop.permute.xlu1 %1915 }
 0x363   : > { %2629 = vst.msk [vmem:[%s3835_s15 + $0xc4] sm:$0xf] %vm1560_vm0, %v1916_v48 }
 0x364   : > { %v2172_v62 = vpop.permute.xlu0 %2171 }
 0x365   : > { %2692 = vst.msk [vmem:[%s4047_s17 + $0xc0] sm:$0xf] %vm1560_vm0, %v2172_v62 }
 0x366   : > { %v2178_v23 = vpop.permute.xlu1 %2177 }
 0x367   : > { %2695 = vst.msk [vmem:[%s4047_s17 + $0xcc] sm:$0xf] %vm1560_vm0, %v2178_v23 }
 0x368   : > { %v1918_v13 = vpop.permute.xlu0 %1917 }
 0x369   : > { %2630 = vst.msk [vmem:[%s3835_s15 + $0xc8] sm:$0xf] %vm1560_vm0, %v1918_v13 }
 0x36a   : > { %v2045_v6 = vpop.permute.xlu1 %2044 }
 0x36b   : > { %2661 = vst.msk [vmem:[%s3842_s16 + $0xc4] sm:$0xf] %vm1560_vm0, %v2045_v6 }
 0x36c   : > { %v2184_v59 = vpop.permute.xlu0 %2183 }
 0x36d   : > { %2698 = vst.msk [vmem:[%s4047_s17 + $0xd8] sm:$0xf] %vm1560_vm0, %v2184_v59 }
 0x36e   : > { %v2174_v42 = vpop.permute.xlu1 %2173 }
 0x36f   : > { %2693 = vst.msk [vmem:[%s4047_s17 + $0xc4] sm:$0xf] %vm1560_vm0, %v2174_v42 }
 0x370   : > { %v2047_v56 = vpop.permute.xlu0 %2046 }
 0x371   : > { %2662 = vst.msk [vmem:[%s3842_s16 + $0xc8] sm:$0xf] %vm1560_vm0, %v2047_v56 }
 0x372   : > { %v1920_v28 = vpop.permute.xlu1 %1919 }
 0x373   : > { %2631 = vst.msk [vmem:[%s3835_s15 + $0xcc] sm:$0xf] %vm1560_vm0, %v1920_v28 }
 0x374   : > { %v2180_v38 = vpop.permute.xlu0 %2179 }
 0x375   : > { %2696 = vst.msk [vmem:[%s4047_s17 + $0xd0] sm:$0xf] %vm1560_vm0, %v2180_v38 }
 0x376   : > { %v2186_v10 = vpop.permute.xlu1 %2185 }
 0x377   : > { %2699 = vst.msk [vmem:[%s4047_s17 + $0xdc] sm:$0xf] %vm1560_vm0, %v2186_v10 }
 0x378   : > { %v1922_v27 = vpop.permute.xlu0 %1921 }
 0x379   : > { %2632 = vst.msk [vmem:[%s3835_s15 + $0xd0] sm:$0xf] %vm1560_vm0, %v1922_v27 }
 0x37a   : > { %v2049_v55 = vpop.permute.xlu1 %2048 }
 0x37b   : > { %2663 = vst.msk [vmem:[%s3842_s16 + $0xcc] sm:$0xf] %vm1560_vm0, %v2049_v55 }
 0x37c   : > { %v2192_v8 = vpop.permute.xlu0 %2191 }
 0x37d   : > { %2702 = vst.msk [vmem:[%s4047_s17 + $0xe8] sm:$0xf] %vm1560_vm0, %v2192_v8 }
 0x37e   : > { %v2182_v51 = vpop.permute.xlu1 %2181 }
 0x37f   : > { %2697 = vst.msk [vmem:[%s4047_s17 + $0xd4] sm:$0xf] %vm1560_vm0, %v2182_v51 }
 0x380   : > { %v2051_v26 = vpop.permute.xlu0 %2050 }
 0x381   : > { %2664 = vst.msk [vmem:[%s3842_s16 + $0xd0] sm:$0xf] %vm1560_vm0, %v2051_v26 }
 0x382   : > { %v1924_v36 = vpop.permute.xlu1 %1923 }
 0x383   : > { %2633 = vst.msk [vmem:[%s3835_s15 + $0xd4] sm:$0xf] %vm1560_vm0, %v1924_v36 }
 0x384   : > { %v2188_v50 = vpop.permute.xlu0 %2187 }
 0x385   : > { %2700 = vst.msk [vmem:[%s4047_s17 + $0xe0] sm:$0xf] %vm1560_vm0, %v2188_v50 }
 0x386   : > { %v2194_v15 = vpop.permute.xlu1 %2193 }
 0x387   : > { %2703 = vst.msk [vmem:[%s4047_s17 + $0xec] sm:$0xf] %vm1560_vm0, %v2194_v15 }
 0x388   : > { %v1926_v3 = vpop.permute.xlu0 %1925 }
 0x389   : > { %2634 = vst.msk [vmem:[%s3835_s15 + $0xd8] sm:$0xf] %vm1560_vm0, %v1926_v3 }
 0x38a   : > { %v2053_v63 = vpop.permute.xlu1 %2052 }
 0x38b   : > { %2665 = vst.msk [vmem:[%s3842_s16 + $0xd4] sm:$0xf] %vm1560_vm0, %v2053_v63 }
 0x38c   : > { %v2055_v49 = vpop.permute.xlu0 %2054 }
 0x38d   : > { %2666 = vst.msk [vmem:[%s3842_s16 + $0xd8] sm:$0xf] %vm1560_vm0, %v2055_v49 }
 0x38e   : > { %v2190_v16 = vpop.permute.xlu1 %2189 }
 0x38f   : > { %2701 = vst.msk [vmem:[%s4047_s17 + $0xe4] sm:$0xf] %vm1560_vm0, %v2190_v16 }
 0x390   : > { %v2196_v53 = vpop.permute.xlu0 %2195 }
 0x391   : > { %2704 = vst.msk [vmem:[%s4047_s17 + $0xf0] sm:$0xf] %vm1560_vm0, %v2196_v53 }
 0x392   : > { %v1928_v21 = vpop.permute.xlu1 %1927 }
 0x393   : > { %2635 = vst.msk [vmem:[%s3835_s15 + $0xdc] sm:$0xf] %vm1560_vm0, %v1928_v21 }
 0x394   : > { %v2200_v29 = vpop.permute.xlu0 %2199 }
 0x395   : > { %2706 = vst.msk [vmem:[%s4047_s17 + $0xf8] sm:$0xf] %vm1560_vm0, %v2200_v29 }
 0x396   : > { %v2057_v30 = vpop.permute.xlu1 %2056 }
 0x397   : > { %2667 = vst.msk [vmem:[%s3842_s16 + $0xdc] sm:$0xf] %vm1560_vm0, %v2057_v30 }
 0x39a   : > { %v2198_v34 = vpop.permute.xlu1 %2197 }
 0x39b   : > { %2705 = vst.msk [vmem:[%s4047_s17 + $0xf4] sm:$0xf] %vm1560_vm0, %v2198_v34 }
 0x39e   : > { %v2202_v57 = vpop.permute.xlu1 %2201 }
 0x39f   : > { %2707 = vst.msk [vmem:[%s4047_s17 + $0xfc] sm:$0xf] %vm1560_vm0, %v2202_v57 }
 0x3a0 PF: > { %s22_s29 = sadd.s32 1, %s3178_s29   ;;  %s4802_s24 = smov %s3162_s25 }
 0x3a1   : > { %p19_p1 = scmp.ge.s32.totalorder %s22_s29, 4   ;;  %s4803_s25 = smov %s3166_s26 }
 0x3a2   : > { %s4804_s26 = smov %s3311_s20  ;;  %s4805_s27 = smov %s3174_s28 }
 0x3a3   : > { %s4806_s28 = smov %s4808_s14  ;;  %21 = sbr.rel (!%p19_p1) target bundleno = 5 (0x5), region = 111 }
 0x3aa   :  { %2348 = vsyncpa [#allocation3], 1 }
 0x3ab   :  { %2350 = vsyncpa [#allocation3 + $0x1], 1 }
 0x3ac   :  { %2351 = vsyncpa [#allocation5], 1 }

</bundles_post_ra>
